<compile_context>
chip_gen: v7x
topology: tpu7x:2x2x1
jax: 0.10.0
libtpu: 0.0.40
codegen_flags: <defaults>
</compile_context>

<pallas_src>
import functools
import math

import jax
import jax.numpy as jnp
from jax.experimental import pallas as pl
from jax.experimental.pallas import tpu as pltpu


_NEG_BIG = -1e30   # bias for padded logit columns -> exp underflows to exactly 0
_TT_MAX = 16       # timesteps per grid block (review: 8-32 is plenty)


def _round_up(x, m):
    return (x + m - 1) // m * m


def _rnn_block_kernel(x_ref, h0_ref, wx_ref, whh_ref, who_ref, b_ref,
                      out_ref, hfin_ref, xw_ref,
                      *, h_pad, tt, b_pad, t_total, mask_tail):
    blk = pl.program_id(0)

    # First block: seed the resident hidden carry. hfin has a constant
    # index_map, so its block stays in VMEM across all grid steps and acts as
    # the cross-block carry; it is only written back to HBM at the end.
    @pl.when(blk == 0)
    def _():
        hfin_ref[...] = h0_ref[...]

    # Hoisted x projection for the whole time block: a single MXU pass over
    # (Tt*B_pad, I) plus one bias broadcast, stored to a VMEM scratch.
    i_dim = x_ref.shape[-1]
    x_block = x_ref[...].reshape(tt * b_pad, i_dim)
    xw = jnp.dot(x_block, wx_ref[...], preferred_element_type=jnp.float32)
    xw = xw + b_ref[...]
    xw_ref[...] = xw.reshape(tt, b_pad, xw.shape[-1])

    h_init = hfin_ref[...]

    def step(t, h):
        xw_t = xw_ref[t]                                   # (B_pad, H_pad+O_pad)
        # Critical recurrence path: only the 128 hidden columns.
        h_new = xw_t[:, :h_pad] + jnp.dot(
            h, whh_ref[...], preferred_element_type=jnp.float32)
        if mask_tail:
            valid = (blk * tt + t) < t_total
            h_new = jnp.where(valid, h_new, h)
        # Off the recurrence: logits + log-softmax (depend only on old h).
        logits = xw_t[:, h_pad:] + jnp.dot(
            h, who_ref[...], preferred_element_type=jnp.float32)
        m = jnp.max(logits, axis=1, keepdims=True)
        shifted = logits - m
        p = jnp.exp(shifted)                               # single exp, reused
        lse = jnp.log(jnp.sum(p, axis=1, keepdims=True))
        out_ref[t] = shifted - lse                         # lane-dense store
        return h_new

    hfin_ref[...] = jax.lax.fori_loop(0, tt, step, h_init, unroll=True)


def pack_params(w_i2h, b_i2h, w_i2o, b_i2o, input_size):
    """Repack PyTorch (out, in)-layout weights once per parameter set.

    Returns (wx, whh, who, b):
      wx  : (I, H_pad+O_pad)  input -> [hidden | logits] fused columns
      whh : (H_pad, H_pad)    hidden -> hidden (critical recurrence)
      who : (H_pad, O_pad)    hidden -> logits (off the recurrence)
      b   : (1, H_pad+O_pad)  fused bias; padded logit cols = -1e30
    """
    f32 = jnp.float32
    w_i2h = jnp.asarray(w_i2h, f32)
    w_i2o = jnp.asarray(w_i2o, f32)
    b_i2h = jnp.asarray(b_i2h, f32)
    b_i2o = jnp.asarray(b_i2o, f32)

    I = input_size
    H = w_i2h.shape[0]
    O = w_i2o.shape[0]
    H_pad = _round_up(H, 128)
    O_pad = _round_up(O, 128)
    N_f = H_pad + O_pad

    wx = jnp.zeros((I, N_f), f32)
    wx = wx.at[:, :H].set(w_i2h[:, :I].T)
    wx = wx.at[:, H_pad:H_pad + O].set(w_i2o[:, :I].T)

    whh = jnp.zeros((H_pad, H_pad), f32).at[:H, :H].set(w_i2h[:, I:].T)
    who = jnp.zeros((H_pad, O_pad), f32).at[:H, :O].set(w_i2o[:, I:].T)

    b = jnp.full((1, N_f), _NEG_BIG, f32)
    b = b.at[:, :H_pad].set(0.0)          # padded hidden cols stay 0
    b = b.at[:, :H].set(b_i2h)
    b = b.at[:, H_pad:H_pad + O].set(b_i2o)
    return wx, whh, who, b


@functools.partial(jax.jit, static_argnames=("hidden_size", "output_size"))
def rnn_forward_packed(xs, h0, wx, whh, who, b, *, hidden_size, output_size):
    """Full-sequence forward with pre-packed weights.

    xs: (T, B, I) float32, h0: (B, H) float32.
    returns (log_probs (T, B, O), final_hidden (B, H))
    """
    T, B, I = xs.shape
    H, O = hidden_size, output_size
    H_pad = whh.shape[0]
    O_pad = who.shape[1]
    N_f = H_pad + O_pad
    B_pad = _round_up(B, 8)

    Tt = T if T <= _TT_MAX else _TT_MAX      # timesteps per grid block
    T_pad = _round_up(T, Tt)
    n_blocks = T_pad // Tt
    mask_tail = T_pad != T                   # guard hidden update on tail pad

    f32 = jnp.float32
    xs_p = jnp.zeros((T_pad, B_pad, I), f32).at[:T, :B, :].set(xs.astype(f32))
    h0_p = jnp.zeros((B_pad, H_pad), f32).at[:B, :H].set(h0.astype(f32))

    kernel = functools.partial(
        _rnn_block_kernel, h_pad=H_pad, tt=Tt, b_pad=B_pad,
        t_total=T, mask_tail=mask_tail)

    out_p, hfin_p = pl.pallas_call(
        kernel,
        grid=(n_blocks,),
        in_specs=[
            pl.BlockSpec((Tt, B_pad, I), lambda blk: (blk, 0, 0)),    # x block
            pl.BlockSpec((B_pad, H_pad), lambda blk: (0, 0)),         # h0 (resident)
            pl.BlockSpec((I, N_f), lambda blk: (0, 0)),               # Wx (resident)
            pl.BlockSpec((H_pad, H_pad), lambda blk: (0, 0)),         # Wh_h (resident)
            pl.BlockSpec((H_pad, O_pad), lambda blk: (0, 0)),         # Wh_o (resident)
            pl.BlockSpec((1, N_f), lambda blk: (0, 0)),               # bias (resident)
        ],
        out_specs=(
            pl.BlockSpec((Tt, B_pad, O_pad), lambda blk: (blk, 0, 0)),  # per-block out
            pl.BlockSpec((B_pad, H_pad), lambda blk: (0, 0)),           # hidden carry
        ),
        out_shape=(
            jax.ShapeDtypeStruct((T_pad, B_pad, O_pad), f32),
            jax.ShapeDtypeStruct((B_pad, H_pad), f32),
        ),
        scratch_shapes=[pltpu.VMEM((Tt, B_pad, N_f), f32)],           # hoisted x@Wx+b
        compiler_params=pltpu.CompilerParams(
            dimension_semantics=("arbitrary",)),                      # sequential time
    )(xs_p, h0_p, wx, whh, who, b)

    return out_p[:T, :B, :O], hfin_p[:B, :H]


def rnn_sequence(xs, h0, w_i2h, b_i2h, w_i2o, b_i2o):
    """Convenience wrapper: pack params, then run the kernel."""
    packed = pack_params(w_i2h, b_i2h, w_i2o, b_i2o, xs.shape[-1])
    return rnn_forward_packed(xs, h0, *packed,
                              hidden_size=h0.shape[-1],
                              output_size=w_i2o.shape[0])


def rnn_cell(input_vec, hidden, w_i2h, b_i2h, w_i2o, b_i2o):
    """Single-step forward matching the PyTorch module's forward()."""
    out, h_new = rnn_sequence(input_vec[None], hidden,
                              w_i2h, b_i2h, w_i2o, b_i2o)
    return out[0], h_new


# ----------------------- reference + demo ----------------------------------

def init_params(key, input_size, hidden_size, output_size):
    k1, k2, k3, k4 = jax.random.split(key, 4)
    fan_in = input_size + hidden_size
    bound = 1.0 / math.sqrt(fan_in)
    w_i2h = jax.random.uniform(k1, (hidden_size, fan_in), jnp.float32, -bound, bound)
    b_i2h = jax.random.uniform(k2, (hidden_size,), jnp.float32, -bound, bound)
    w_i2o = jax.random.uniform(k3, (output_size, fan_in), jnp.float32, -bound, bound)
    b_i2o = jax.random.uniform(k4, (output_size,), jnp.float32, -bound, bound)
    return w_i2h, b_i2h, w_i2o, b_i2o


def ref_step(x, h, w_i2h, b_i2h, w_i2o, b_i2o):
    combined = jnp.concatenate([x, h], axis=1)
    h_new = combined @ w_i2h.T + b_i2h
    log_probs = jax.nn.log_softmax(combined @ w_i2o.T + b_i2o, axis=1)
    return log_probs, h_new


def ref_sequence(xs, h0, w_i2h, b_i2h, w_i2o, b_i2o):
    h = h0
    outs = []
    for t in range(xs.shape[0]):
        o, h = ref_step(xs[t], h, w_i2h, b_i2h, w_i2o, b_i2o)
        outs.append(o)
    return jnp.stack(outs), h


if __name__ == "__main__":
    B, T, INPUT, HIDDEN, OUTPUT = 2, 8, 16, 32, 8

    key = jax.random.PRNGKey(0)
    kx, kp, kx2 = jax.random.split(key, 3)
    xs = jax.random.normal(kx, (T, B, INPUT), jnp.float32)
    h0 = jnp.zeros((B, HIDDEN), jnp.float32)   # initHidden, broadcast to batch

    w_i2h, b_i2h, w_i2o, b_i2o = init_params(kp, INPUT, HIDDEN, OUTPUT)
    packed = pack_params(w_i2h, b_i2h, w_i2o, b_i2o, INPUT)

    # 1) Full sequence, single time block (T <= Tt).
    log_probs, h_fin = rnn_forward_packed(xs, h0, *packed,
                                          hidden_size=HIDDEN, output_size=OUTPUT)
    jax.block_until_ready((log_probs, h_fin))
    ref_lp, ref_h = ref_sequence(xs, h0, w_i2h, b_i2h, w_i2o, b_i2o)
    assert jnp.allclose(log_probs, ref_lp, atol=1e-4, rtol=1e-4)
    assert jnp.allclose(h_fin, ref_h, atol=1e-4, rtol=1e-4)

    # 2) Longer sequence: multiple time blocks + tail masking (T=37, Tt=16).
    T2 = 37
    xs2 = jax.random.normal(kx2, (T2, B, INPUT), jnp.float32)
    lp2, hf2 = rnn_forward_packed(xs2, h0, *packed,
                                  hidden_size=HIDDEN, output_size=OUTPUT)
    jax.block_until_ready((lp2, hf2))
    r_lp2, r_h2 = ref_sequence(xs2, h0, w_i2h, b_i2h, w_i2o, b_i2o)
    assert jnp.allclose(lp2, r_lp2, atol=1e-4, rtol=1e-4)
    assert jnp.allclose(hf2, r_h2, atol=1e-4, rtol=1e-4)

    # 3) Single-step API matching the original module forward().
    lp1, h1 = rnn_cell(xs[0], h0, w_i2h, b_i2h, w_i2o, b_i2o)
    r_lp1, r_h1 = ref_step(xs[0], h0, w_i2h, b_i2h, w_i2o, b_i2o)
    jax.block_until_ready((lp1, h1))
    assert jnp.allclose(lp1, r_lp1, atol=1e-4, rtol=1e-4)
    assert jnp.allclose(h1, r_h1, atol=1e-4, rtol=1e-4)

    print("KERNEL_OK")
</pallas_src>

<mosaic_0001>
module attributes {stable_mosaic.version = 11 : i64} {
  func.func @_rnn_block_kernel(%arg0: i32, %arg1: memref<8x8x16xf32, #tpu.memory_space<vmem>>, %arg2: memref<8x128xf32, #tpu.memory_space<vmem>>, %arg3: memref<16x256xf32, #tpu.memory_space<vmem>>, %arg4: memref<128x128xf32, #tpu.memory_space<vmem>>, %arg5: memref<128x128xf32, #tpu.memory_space<vmem>>, %arg6: memref<1x256xf32, #tpu.memory_space<vmem>>, %arg7: memref<8x8x128xf32, #tpu.memory_space<vmem>>, %arg8: memref<8x128xf32, #tpu.memory_space<vmem>>, %arg9: memref<8x8x256xf32, #tpu.memory_space<vmem>>) attributes {dimension_semantics = [#tpu.dimension_semantics<arbitrary>], iteration_bounds = array<i64: 1>, scalar_prefetch = 0 : i64, scratch_operands = 1 : i64, tpu.core_type = #tpu.core_type<tc>, window_params = [{transform_indices = @transform_0, window_bounds = array<i64: 8, 8, 16>}, {pipeline_mode = #tpu.pipeline_mode<synchronous>, transform_indices = @transform_1, window_bounds = array<i64: 8, 128>}, {pipeline_mode = #tpu.pipeline_mode<synchronous>, transform_indices = @transform_2, window_bounds = array<i64: 16, 256>}, {pipeline_mode = #tpu.pipeline_mode<synchronous>, transform_indices = @transform_3, window_bounds = array<i64: 128, 128>}, {pipeline_mode = #tpu.pipeline_mode<synchronous>, transform_indices = @transform_4, window_bounds = array<i64: 128, 128>}, {pipeline_mode = #tpu.pipeline_mode<synchronous>, transform_indices = @transform_5, window_bounds = array<i64: 1, 256>}, {transform_indices = @transform_6, window_bounds = array<i64: 8, 8, 128>}, {pipeline_mode = #tpu.pipeline_mode<synchronous>, transform_indices = @transform_7, window_bounds = array<i64: 8, 128>}]} {
    %c0_i32 = arith.constant 0 : i32
    %0 = arith.cmpi eq, %arg0, %c0_i32 : i32
    %1 = arith.extui %0 : i1 to i32
    %c0_i32_0 = arith.constant 0 : i32
    %2 = arith.cmpi ne, %1, %c0_i32_0 : i32
    scf.if %2 {
      %c0_111 = arith.constant 0 : index
      %c0_112 = arith.constant 0 : index
      %214 = vector.load %arg2[%c0_111, %c0_112] : memref<8x128xf32, #tpu.memory_space<vmem>>, vector<8x128xf32>
      %c0_113 = arith.constant 0 : index
      %c0_114 = arith.constant 0 : index
      %215 = vector.load %arg8[%c0_113, %c0_114] : memref<8x128xf32, #tpu.memory_space<vmem>>, vector<8x128xf32>
      tpu.vector_store %arg8[%c0_113, %c0_114], %214 {strides = array<i32>} : memref<8x128xf32, #tpu.memory_space<vmem>>, vector<8x128xf32>,
    } else {
    }
    %c0 = arith.constant 0 : index
    %c0_1 = arith.constant 0 : index
    %c0_2 = arith.constant 0 : index
    %3 = vector.load %arg1[%c0, %c0_1, %c0_2] : memref<8x8x16xf32, #tpu.memory_space<vmem>>, vector<8x8x16xf32>
    %4 = vector.shape_cast %3 : vector<8x8x16xf32> to vector<64x16xf32>
    %c0_3 = arith.constant 0 : index
    %c0_4 = arith.constant 0 : index
    %5 = vector.load %arg3[%c0_3, %c0_4] : memref<16x256xf32, #tpu.memory_space<vmem>>, vector<16x256xf32>
    %cst = arith.constant dense<0.000000e+00> : vector<64x256xf32>
    %6 = tpu.matmul %4, %5, %cst {dimension_numbers = #tpu.dot_dimension_numbers<[1], [0], [0], [1], [0, 0, 1, 1], [], []>} : vector<64x16xf32>, vector<16x256xf32>, vector<64x256xf32> -> vector<64x256xf32>
    %c0_5 = arith.constant 0 : index
    %c0_6 = arith.constant 0 : index
    %7 = vector.load %arg6[%c0_5, %c0_6] : memref<1x256xf32, #tpu.memory_space<vmem>>, vector<1x256xf32>
    %8 = vector.broadcast %7 : vector<1x256xf32> to vector<64x256xf32>
    %9 = arith.addf %6, %8 : vector<64x256xf32>
    %10 = vector.shape_cast %9 : vector<64x256xf32> to vector<8x8x256xf32>
    %c0_7 = arith.constant 0 : index
    %c0_8 = arith.constant 0 : index
    %c0_9 = arith.constant 0 : index
    %11 = vector.load %arg9[%c0_7, %c0_8, %c0_9] : memref<8x8x256xf32, #tpu.memory_space<vmem>>, vector<8x8x256xf32>
    tpu.vector_store %arg9[%c0_7, %c0_8, %c0_9], %10 {strides = array<i32>} : memref<8x8x256xf32, #tpu.memory_space<vmem>>, vector<8x8x256xf32>,
    %c0_10 = arith.constant 0 : index
    %c0_11 = arith.constant 0 : index
    %12 = vector.load %arg8[%c0_10, %c0_11] : memref<8x128xf32, #tpu.memory_space<vmem>>, vector<8x128xf32>
    %c0_i32_12 = arith.constant 0 : i32
    %13 = arith.index_cast %c0_i32_12 : i32 to index
    %c0_13 = arith.constant 0 : index
    %c0_14 = arith.constant 0 : index
    %14 = vector.load %arg9[%13, %c0_13, %c0_14] : memref<8x8x256xf32, #tpu.memory_space<vmem>>, vector<1x8x256xf32>
    %15 = vector.shape_cast %14 : vector<1x8x256xf32> to vector<8x256xf32>
    %16 = vector.extract_strided_slice %15 {offsets = [0, 0], sizes = [8, 128], strides = [1, 1]} : vector<8x256xf32> to vector<8x128xf32>
    %c0_15 = arith.constant 0 : index
    %c0_16 = arith.constant 0 : index
    %17 = vector.load %arg4[%c0_15, %c0_16] : memref<128x128xf32, #tpu.memory_space<vmem>>, vector<128x128xf32>
    %cst_17 = arith.constant dense<0.000000e+00> : vector<8x128xf32>
    %18 = tpu.matmul %12, %17, %cst_17 {dimension_numbers = #tpu.dot_dimension_numbers<[1], [0], [0], [1], [0, 0, 1, 1], [], []>} : vector<8x128xf32>, vector<128x128xf32>, vector<8x128xf32> -> vector<8x128xf32>
    %19 = arith.addf %16, %18 : vector<8x128xf32>
    %20 = vector.extract_strided_slice %15 {offsets = [0, 128], sizes = [8, 128], strides = [1, 1]} : vector<8x256xf32> to vector<8x128xf32>
    %c0_18 = arith.constant 0 : index
    %c0_19 = arith.constant 0 : index
    %21 = vector.load %arg5[%c0_18, %c0_19] : memref<128x128xf32, #tpu.memory_space<vmem>>, vector<128x128xf32>
    %cst_20 = arith.constant dense<0.000000e+00> : vector<8x128xf32>
    %22 = tpu.matmul %12, %21, %cst_20 {dimension_numbers = #tpu.dot_dimension_numbers<[1], [0], [0], [1], [0, 0, 1, 1], [], []>} : vector<8x128xf32>, vector<128x128xf32>, vector<8x128xf32> -> vector<8x128xf32>
    %23 = arith.addf %20, %22 : vector<8x128xf32>
    %cst_21 = arith.constant dense<0xFF800000> : vector<8xf32>
    %24 = vector.multi_reduction <maximumf>, %23, %cst_21 [1] : vector<8x128xf32> to vector<8xf32>
    %25 = vector.shape_cast %24 : vector<8xf32> to vector<8x1xf32>
    %26 = vector.broadcast %25 : vector<8x1xf32> to vector<8x128xf32>
    %27 = arith.subf %23, %26 : vector<8x128xf32>
    %28 = math.exp %27 : vector<8x128xf32>
    %cst_22 = arith.constant dense<0.000000e+00> : vector<8xf32>
    %29 = vector.multi_reduction <add>, %28, %cst_22 [1] : vector<8x128xf32> to vector<8xf32>
    %30 = vector.shape_cast %29 : vector<8xf32> to vector<8x1xf32>
    %31 = math.log %30 : vector<8x1xf32>
    %32 = vector.broadcast %31 : vector<8x1xf32> to vector<8x128xf32>
    %33 = arith.subf %27, %32 : vector<8x128xf32>
    %34 = arith.index_cast %c0_i32_12 : i32 to index
    %c0_23 = arith.constant 0 : index
    %c0_24 = arith.constant 0 : index
    %35 = vector.load %arg7[%34, %c0_23, %c0_24] : memref<8x8x128xf32, #tpu.memory_space<vmem>>, vector<1x8x128xf32>
    %36 = vector.shape_cast %35 : vector<1x8x128xf32> to vector<8x128xf32>
    %37 = vector.shape_cast %33 : vector<8x128xf32> to vector<1x8x128xf32>
    tpu.vector_store %arg7[%34, %c0_23, %c0_24], %37 {strides = array<i32>} : memref<8x8x128xf32, #tpu.memory_space<vmem>>, vector<1x8x128xf32>,
    %c1_i32 = arith.constant 1 : i32
    %38 = arith.index_cast %c1_i32 : i32 to index
    %c0_25 = arith.constant 0 : index
    %c0_26 = arith.constant 0 : index
    %39 = vector.load %arg9[%38, %c0_25, %c0_26] : memref<8x8x256xf32, #tpu.memory_space<vmem>>, vector<1x8x256xf32>
    %40 = vector.shape_cast %39 : vector<1x8x256xf32> to vector<8x256xf32>
    %41 = vector.extract_strided_slice %40 {offsets = [0, 0], sizes = [8, 128], strides = [1, 1]} : vector<8x256xf32> to vector<8x128xf32>
    %c0_27 = arith.constant 0 : index
    %c0_28 = arith.constant 0 : index
    %42 = vector.load %arg4[%c0_27, %c0_28] : memref<128x128xf32, #tpu.memory_space<vmem>>, vector<128x128xf32>
    %cst_29 = arith.constant dense<0.000000e+00> : vector<8x128xf32>
    %43 = tpu.matmul %19, %42, %cst_29 {dimension_numbers = #tpu.dot_dimension_numbers<[1], [0], [0], [1], [0, 0, 1, 1], [], []>} : vector<8x128xf32>, vector<128x128xf32>, vector<8x128xf32> -> vector<8x128xf32>
    %44 = arith.addf %41, %43 : vector<8x128xf32>
    %45 = vector.extract_strided_slice %40 {offsets = [0, 128], sizes = [8, 128], strides = [1, 1]} : vector<8x256xf32> to vector<8x128xf32>
    %c0_30 = arith.constant 0 : index
    %c0_31 = arith.constant 0 : index
    %46 = vector.load %arg5[%c0_30, %c0_31] : memref<128x128xf32, #tpu.memory_space<vmem>>, vector<128x128xf32>
    %cst_32 = arith.constant dense<0.000000e+00> : vector<8x128xf32>
    %47 = tpu.matmul %19, %46, %cst_32 {dimension_numbers = #tpu.dot_dimension_numbers<[1], [0], [0], [1], [0, 0, 1, 1], [], []>} : vector<8x128xf32>, vector<128x128xf32>, vector<8x128xf32> -> vector<8x128xf32>
    %48 = arith.addf %45, %47 : vector<8x128xf32>
    %cst_33 = arith.constant dense<0xFF800000> : vector<8xf32>
    %49 = vector.multi_reduction <maximumf>, %48, %cst_33 [1] : vector<8x128xf32> to vector<8xf32>
    %50 = vector.shape_cast %49 : vector<8xf32> to vector<8x1xf32>
    %51 = vector.broadcast %50 : vector<8x1xf32> to vector<8x128xf32>
    %52 = arith.subf %48, %51 : vector<8x128xf32>
    %53 = math.exp %52 : vector<8x128xf32>
    %cst_34 = arith.constant dense<0.000000e+00> : vector<8xf32>
    %54 = vector.multi_reduction <add>, %53, %cst_34 [1] : vector<8x128xf32> to vector<8xf32>
    %55 = vector.shape_cast %54 : vector<8xf32> to vector<8x1xf32>
    %56 = math.log %55 : vector<8x1xf32>
    %57 = vector.broadcast %56 : vector<8x1xf32> to vector<8x128xf32>
    %58 = arith.subf %52, %57 : vector<8x128xf32>
    %59 = arith.index_cast %c1_i32 : i32 to index
    %c0_35 = arith.constant 0 : index
    %c0_36 = arith.constant 0 : index
    %60 = vector.load %arg7[%59, %c0_35, %c0_36] : memref<8x8x128xf32, #tpu.memory_space<vmem>>, vector<1x8x128xf32>
    %61 = vector.shape_cast %60 : vector<1x8x128xf32> to vector<8x128xf32>
    %62 = vector.shape_cast %58 : vector<8x128xf32> to vector<1x8x128xf32>
    tpu.vector_store %arg7[%59, %c0_35, %c0_36], %62 {strides = array<i32>} : memref<8x8x128xf32, #tpu.memory_space<vmem>>, vector<1x8x128xf32>,
    %c2_i32 = arith.constant 2 : i32
    %63 = arith.index_cast %c2_i32 : i32 to index
    %c0_37 = arith.constant 0 : index
    %c0_38 = arith.constant 0 : index
    %64 = vector.load %arg9[%63, %c0_37, %c0_38] : memref<8x8x256xf32, #tpu.memory_space<vmem>>, vector<1x8x256xf32>
    %65 = vector.shape_cast %64 : vector<1x8x256xf32> to vector<8x256xf32>
    %66 = vector.extract_strided_slice %65 {offsets = [0, 0], sizes = [8, 128], strides = [1, 1]} : vector<8x256xf32> to vector<8x128xf32>
    %c0_39 = arith.constant 0 : index
    %c0_40 = arith.constant 0 : index
    %67 = vector.load %arg4[%c0_39, %c0_40] : memref<128x128xf32, #tpu.memory_space<vmem>>, vector<128x128xf32>
    %cst_41 = arith.constant dense<0.000000e+00> : vector<8x128xf32>
    %68 = tpu.matmul %44, %67, %cst_41 {dimension_numbers = #tpu.dot_dimension_numbers<[1], [0], [0], [1], [0, 0, 1, 1], [], []>} : vector<8x128xf32>, vector<128x128xf32>, vector<8x128xf32> -> vector<8x128xf32>
    %69 = arith.addf %66, %68 : vector<8x128xf32>
    %70 = vector.extract_strided_slice %65 {offsets = [0, 128], sizes = [8, 128], strides = [1, 1]} : vector<8x256xf32> to vector<8x128xf32>
    %c0_42 = arith.constant 0 : index
    %c0_43 = arith.constant 0 : index
    %71 = vector.load %arg5[%c0_42, %c0_43] : memref<128x128xf32, #tpu.memory_space<vmem>>, vector<128x128xf32>
    %cst_44 = arith.constant dense<0.000000e+00> : vector<8x128xf32>
    %72 = tpu.matmul %44, %71, %cst_44 {dimension_numbers = #tpu.dot_dimension_numbers<[1], [0], [0], [1], [0, 0, 1, 1], [], []>} : vector<8x128xf32>, vector<128x128xf32>, vector<8x128xf32> -> vector<8x128xf32>
    %73 = arith.addf %70, %72 : vector<8x128xf32>
    %cst_45 = arith.constant dense<0xFF800000> : vector<8xf32>
    %74 = vector.multi_reduction <maximumf>, %73, %cst_45 [1] : vector<8x128xf32> to vector<8xf32>
    %75 = vector.shape_cast %74 : vector<8xf32> to vector<8x1xf32>
    %76 = vector.broadcast %75 : vector<8x1xf32> to vector<8x128xf32>
    %77 = arith.subf %73, %76 : vector<8x128xf32>
    %78 = math.exp %77 : vector<8x128xf32>
    %cst_46 = arith.constant dense<0.000000e+00> : vector<8xf32>
    %79 = vector.multi_reduction <add>, %78, %cst_46 [1] : vector<8x128xf32> to vector<8xf32>
    %80 = vector.shape_cast %79 : vector<8xf32> to vector<8x1xf32>
    %81 = math.log %80 : vector<8x1xf32>
    %82 = vector.broadcast %81 : vector<8x1xf32> to vector<8x128xf32>
    %83 = arith.subf %77, %82 : vector<8x128xf32>
    %84 = arith.index_cast %c2_i32 : i32 to index
    %c0_47 = arith.constant 0 : index
    %c0_48 = arith.constant 0 : index
    %85 = vector.load %arg7[%84, %c0_47, %c0_48] : memref<8x8x128xf32, #tpu.memory_space<vmem>>, vector<1x8x128xf32>
    %86 = vector.shape_cast %85 : vector<1x8x128xf32> to vector<8x128xf32>
    %87 = vector.shape_cast %83 : vector<8x128xf32> to vector<1x8x128xf32>
    tpu.vector_store %arg7[%84, %c0_47, %c0_48], %87 {strides = array<i32>} : memref<8x8x128xf32, #tpu.memory_space<vmem>>, vector<1x8x128xf32>,
    %c3_i32 = arith.constant 3 : i32
    %88 = arith.index_cast %c3_i32 : i32 to index
    %c0_49 = arith.constant 0 : index
    %c0_50 = arith.constant 0 : index
    %89 = vector.load %arg9[%88, %c0_49, %c0_50] : memref<8x8x256xf32, #tpu.memory_space<vmem>>, vector<1x8x256xf32>
    %90 = vector.shape_cast %89 : vector<1x8x256xf32> to vector<8x256xf32>
    %91 = vector.extract_strided_slice %90 {offsets = [0, 0], sizes = [8, 128], strides = [1, 1]} : vector<8x256xf32> to vector<8x128xf32>
    %c0_51 = arith.constant 0 : index
    %c0_52 = arith.constant 0 : index
    %92 = vector.load %arg4[%c0_51, %c0_52] : memref<128x128xf32, #tpu.memory_space<vmem>>, vector<128x128xf32>
    %cst_53 = arith.constant dense<0.000000e+00> : vector<8x128xf32>
    %93 = tpu.matmul %69, %92, %cst_53 {dimension_numbers = #tpu.dot_dimension_numbers<[1], [0], [0], [1], [0, 0, 1, 1], [], []>} : vector<8x128xf32>, vector<128x128xf32>, vector<8x128xf32> -> vector<8x128xf32>
    %94 = arith.addf %91, %93 : vector<8x128xf32>
    %95 = vector.extract_strided_slice %90 {offsets = [0, 128], sizes = [8, 128], strides = [1, 1]} : vector<8x256xf32> to vector<8x128xf32>
    %c0_54 = arith.constant 0 : index
    %c0_55 = arith.constant 0 : index
    %96 = vector.load %arg5[%c0_54, %c0_55] : memref<128x128xf32, #tpu.memory_space<vmem>>, vector<128x128xf32>
    %cst_56 = arith.constant dense<0.000000e+00> : vector<8x128xf32>
    %97 = tpu.matmul %69, %96, %cst_56 {dimension_numbers = #tpu.dot_dimension_numbers<[1], [0], [0], [1], [0, 0, 1, 1], [], []>} : vector<8x128xf32>, vector<128x128xf32>, vector<8x128xf32> -> vector<8x128xf32>
    %98 = arith.addf %95, %97 : vector<8x128xf32>
    %cst_57 = arith.constant dense<0xFF800000> : vector<8xf32>
    %99 = vector.multi_reduction <maximumf>, %98, %cst_57 [1] : vector<8x128xf32> to vector<8xf32>
    %100 = vector.shape_cast %99 : vector<8xf32> to vector<8x1xf32>
    %101 = vector.broadcast %100 : vector<8x1xf32> to vector<8x128xf32>
    %102 = arith.subf %98, %101 : vector<8x128xf32>
    %103 = math.exp %102 : vector<8x128xf32>
    %cst_58 = arith.constant dense<0.000000e+00> : vector<8xf32>
    %104 = vector.multi_reduction <add>, %103, %cst_58 [1] : vector<8x128xf32> to vector<8xf32>
    %105 = vector.shape_cast %104 : vector<8xf32> to vector<8x1xf32>
    %106 = math.log %105 : vector<8x1xf32>
    %107 = vector.broadcast %106 : vector<8x1xf32> to vector<8x128xf32>
    %108 = arith.subf %102, %107 : vector<8x128xf32>
    %109 = arith.index_cast %c3_i32 : i32 to index
    %c0_59 = arith.constant 0 : index
    %c0_60 = arith.constant 0 : index
    %110 = vector.load %arg7[%109, %c0_59, %c0_60] : memref<8x8x128xf32, #tpu.memory_space<vmem>>, vector<1x8x128xf32>
    %111 = vector.shape_cast %110 : vector<1x8x128xf32> to vector<8x128xf32>
    %112 = vector.shape_cast %108 : vector<8x128xf32> to vector<1x8x128xf32>
    tpu.vector_store %arg7[%109, %c0_59, %c0_60], %112 {strides = array<i32>} : memref<8x8x128xf32, #tpu.memory_space<vmem>>, vector<1x8x128xf32>,
    %c4_i32 = arith.constant 4 : i32
    %113 = arith.index_cast %c4_i32 : i32 to index
    %c0_61 = arith.constant 0 : index
    %c0_62 = arith.constant 0 : index
    %114 = vector.load %arg9[%113, %c0_61, %c0_62] : memref<8x8x256xf32, #tpu.memory_space<vmem>>, vector<1x8x256xf32>
    %115 = vector.shape_cast %114 : vector<1x8x256xf32> to vector<8x256xf32>
    %116 = vector.extract_strided_slice %115 {offsets = [0, 0], sizes = [8, 128], strides = [1, 1]} : vector<8x256xf32> to vector<8x128xf32>
    %c0_63 = arith.constant 0 : index
    %c0_64 = arith.constant 0 : index
    %117 = vector.load %arg4[%c0_63, %c0_64] : memref<128x128xf32, #tpu.memory_space<vmem>>, vector<128x128xf32>
    %cst_65 = arith.constant dense<0.000000e+00> : vector<8x128xf32>
    %118 = tpu.matmul %94, %117, %cst_65 {dimension_numbers = #tpu.dot_dimension_numbers<[1], [0], [0], [1], [0, 0, 1, 1], [], []>} : vector<8x128xf32>, vector<128x128xf32>, vector<8x128xf32> -> vector<8x128xf32>
    %119 = arith.addf %116, %118 : vector<8x128xf32>
    %120 = vector.extract_strided_slice %115 {offsets = [0, 128], sizes = [8, 128], strides = [1, 1]} : vector<8x256xf32> to vector<8x128xf32>
    %c0_66 = arith.constant 0 : index
    %c0_67 = arith.constant 0 : index
    %121 = vector.load %arg5[%c0_66, %c0_67] : memref<128x128xf32, #tpu.memory_space<vmem>>, vector<128x128xf32>
    %cst_68 = arith.constant dense<0.000000e+00> : vector<8x128xf32>
    %122 = tpu.matmul %94, %121, %cst_68 {dimension_numbers = #tpu.dot_dimension_numbers<[1], [0], [0], [1], [0, 0, 1, 1], [], []>} : vector<8x128xf32>, vector<128x128xf32>, vector<8x128xf32> -> vector<8x128xf32>
    %123 = arith.addf %120, %122 : vector<8x128xf32>
    %cst_69 = arith.constant dense<0xFF800000> : vector<8xf32>
    %124 = vector.multi_reduction <maximumf>, %123, %cst_69 [1] : vector<8x128xf32> to vector<8xf32>
    %125 = vector.shape_cast %124 : vector<8xf32> to vector<8x1xf32>
    %126 = vector.broadcast %125 : vector<8x1xf32> to vector<8x128xf32>
    %127 = arith.subf %123, %126 : vector<8x128xf32>
    %128 = math.exp %127 : vector<8x128xf32>
    %cst_70 = arith.constant dense<0.000000e+00> : vector<8xf32>
    %129 = vector.multi_reduction <add>, %128, %cst_70 [1] : vector<8x128xf32> to vector<8xf32>
    %130 = vector.shape_cast %129 : vector<8xf32> to vector<8x1xf32>
    %131 = math.log %130 : vector<8x1xf32>
    %132 = vector.broadcast %131 : vector<8x1xf32> to vector<8x128xf32>
    %133 = arith.subf %127, %132 : vector<8x128xf32>
    %134 = arith.index_cast %c4_i32 : i32 to index
    %c0_71 = arith.constant 0 : index
    %c0_72 = arith.constant 0 : index
    %135 = vector.load %arg7[%134, %c0_71, %c0_72] : memref<8x8x128xf32, #tpu.memory_space<vmem>>, vector<1x8x128xf32>
    %136 = vector.shape_cast %135 : vector<1x8x128xf32> to vector<8x128xf32>
    %137 = vector.shape_cast %133 : vector<8x128xf32> to vector<1x8x128xf32>
    tpu.vector_store %arg7[%134, %c0_71, %c0_72], %137 {strides = array<i32>} : memref<8x8x128xf32, #tpu.memory_space<vmem>>, vector<1x8x128xf32>,
    %c5_i32 = arith.constant 5 : i32
    %138 = arith.index_cast %c5_i32 : i32 to index
    %c0_73 = arith.constant 0 : index
    %c0_74 = arith.constant 0 : index
    %139 = vector.load %arg9[%138, %c0_73, %c0_74] : memref<8x8x256xf32, #tpu.memory_space<vmem>>, vector<1x8x256xf32>
    %140 = vector.shape_cast %139 : vector<1x8x256xf32> to vector<8x256xf32>
    %141 = vector.extract_strided_slice %140 {offsets = [0, 0], sizes = [8, 128], strides = [1, 1]} : vector<8x256xf32> to vector<8x128xf32>
    %c0_75 = arith.constant 0 : index
    %c0_76 = arith.constant 0 : index
    %142 = vector.load %arg4[%c0_75, %c0_76] : memref<128x128xf32, #tpu.memory_space<vmem>>, vector<128x128xf32>
    %cst_77 = arith.constant dense<0.000000e+00> : vector<8x128xf32>
    %143 = tpu.matmul %119, %142, %cst_77 {dimension_numbers = #tpu.dot_dimension_numbers<[1], [0], [0], [1], [0, 0, 1, 1], [], []>} : vector<8x128xf32>, vector<128x128xf32>, vector<8x128xf32> -> vector<8x128xf32>
    %144 = arith.addf %141, %143 : vector<8x128xf32>
    %145 = vector.extract_strided_slice %140 {offsets = [0, 128], sizes = [8, 128], strides = [1, 1]} : vector<8x256xf32> to vector<8x128xf32>
    %c0_78 = arith.constant 0 : index
    %c0_79 = arith.constant 0 : index
    %146 = vector.load %arg5[%c0_78, %c0_79] : memref<128x128xf32, #tpu.memory_space<vmem>>, vector<128x128xf32>
    %cst_80 = arith.constant dense<0.000000e+00> : vector<8x128xf32>
    %147 = tpu.matmul %119, %146, %cst_80 {dimension_numbers = #tpu.dot_dimension_numbers<[1], [0], [0], [1], [0, 0, 1, 1], [], []>} : vector<8x128xf32>, vector<128x128xf32>, vector<8x128xf32> -> vector<8x128xf32>
    %148 = arith.addf %145, %147 : vector<8x128xf32>
    %cst_81 = arith.constant dense<0xFF800000> : vector<8xf32>
    %149 = vector.multi_reduction <maximumf>, %148, %cst_81 [1] : vector<8x128xf32> to vector<8xf32>
    %150 = vector.shape_cast %149 : vector<8xf32> to vector<8x1xf32>
    %151 = vector.broadcast %150 : vector<8x1xf32> to vector<8x128xf32>
    %152 = arith.subf %148, %151 : vector<8x128xf32>
    %153 = math.exp %152 : vector<8x128xf32>
    %cst_82 = arith.constant dense<0.000000e+00> : vector<8xf32>
    %154 = vector.multi_reduction <add>, %153, %cst_82 [1] : vector<8x128xf32> to vector<8xf32>
    %155 = vector.shape_cast %154 : vector<8xf32> to vector<8x1xf32>
    %156 = math.log %155 : vector<8x1xf32>
    %157 = vector.broadcast %156 : vector<8x1xf32> to vector<8x128xf32>
    %158 = arith.subf %152, %157 : vector<8x128xf32>
    %159 = arith.index_cast %c5_i32 : i32 to index
    %c0_83 = arith.constant 0 : index
    %c0_84 = arith.constant 0 : index
    %160 = vector.load %arg7[%159, %c0_83, %c0_84] : memref<8x8x128xf32, #tpu.memory_space<vmem>>, vector<1x8x128xf32>
    %161 = vector.shape_cast %160 : vector<1x8x128xf32> to vector<8x128xf32>
    %162 = vector.shape_cast %158 : vector<8x128xf32> to vector<1x8x128xf32>
    tpu.vector_store %arg7[%159, %c0_83, %c0_84], %162 {strides = array<i32>} : memref<8x8x128xf32, #tpu.memory_space<vmem>>, vector<1x8x128xf32>,
    %c6_i32 = arith.constant 6 : i32
    %163 = arith.index_cast %c6_i32 : i32 to index
    %c0_85 = arith.constant 0 : index
    %c0_86 = arith.constant 0 : index
    %164 = vector.load %arg9[%163, %c0_85, %c0_86] : memref<8x8x256xf32, #tpu.memory_space<vmem>>, vector<1x8x256xf32>
    %165 = vector.shape_cast %164 : vector<1x8x256xf32> to vector<8x256xf32>
    %166 = vector.extract_strided_slice %165 {offsets = [0, 0], sizes = [8, 128], strides = [1, 1]} : vector<8x256xf32> to vector<8x128xf32>
    %c0_87 = arith.constant 0 : index
    %c0_88 = arith.constant 0 : index
    %167 = vector.load %arg4[%c0_87, %c0_88] : memref<128x128xf32, #tpu.memory_space<vmem>>, vector<128x128xf32>
    %cst_89 = arith.constant dense<0.000000e+00> : vector<8x128xf32>
    %168 = tpu.matmul %144, %167, %cst_89 {dimension_numbers = #tpu.dot_dimension_numbers<[1], [0], [0], [1], [0, 0, 1, 1], [], []>} : vector<8x128xf32>, vector<128x128xf32>, vector<8x128xf32> -> vector<8x128xf32>
    %169 = arith.addf %166, %168 : vector<8x128xf32>
    %170 = vector.extract_strided_slice %165 {offsets = [0, 128], sizes = [8, 128], strides = [1, 1]} : vector<8x256xf32> to vector<8x128xf32>
    %c0_90 = arith.constant 0 : index
    %c0_91 = arith.constant 0 : index
    %171 = vector.load %arg5[%c0_90, %c0_91] : memref<128x128xf32, #tpu.memory_space<vmem>>, vector<128x128xf32>
    %cst_92 = arith.constant dense<0.000000e+00> : vector<8x128xf32>
    %172 = tpu.matmul %144, %171, %cst_92 {dimension_numbers = #tpu.dot_dimension_numbers<[1], [0], [0], [1], [0, 0, 1, 1], [], []>} : vector<8x128xf32>, vector<128x128xf32>, vector<8x128xf32> -> vector<8x128xf32>
    %173 = arith.addf %170, %172 : vector<8x128xf32>
    %cst_93 = arith.constant dense<0xFF800000> : vector<8xf32>
    %174 = vector.multi_reduction <maximumf>, %173, %cst_93 [1] : vector<8x128xf32> to vector<8xf32>
    %175 = vector.shape_cast %174 : vector<8xf32> to vector<8x1xf32>
    %176 = vector.broadcast %175 : vector<8x1xf32> to vector<8x128xf32>
    %177 = arith.subf %173, %176 : vector<8x128xf32>
    %178 = math.exp %177 : vector<8x128xf32>
    %cst_94 = arith.constant dense<0.000000e+00> : vector<8xf32>
    %179 = vector.multi_reduction <add>, %178, %cst_94 [1] : vector<8x128xf32> to vector<8xf32>
    %180 = vector.shape_cast %179 : vector<8xf32> to vector<8x1xf32>
    %181 = math.log %180 : vector<8x1xf32>
    %182 = vector.broadcast %181 : vector<8x1xf32> to vector<8x128xf32>
    %183 = arith.subf %177, %182 : vector<8x128xf32>
    %184 = arith.index_cast %c6_i32 : i32 to index
    %c0_95 = arith.constant 0 : index
    %c0_96 = arith.constant 0 : index
    %185 = vector.load %arg7[%184, %c0_95, %c0_96] : memref<8x8x128xf32, #tpu.memory_space<vmem>>, vector<1x8x128xf32>
    %186 = vector.shape_cast %185 : vector<1x8x128xf32> to vector<8x128xf32>
    %187 = vector.shape_cast %183 : vector<8x128xf32> to vector<1x8x128xf32>
    tpu.vector_store %arg7[%184, %c0_95, %c0_96], %187 {strides = array<i32>} : memref<8x8x128xf32, #tpu.memory_space<vmem>>, vector<1x8x128xf32>,
    %c7_i32 = arith.constant 7 : i32
    %188 = arith.index_cast %c7_i32 : i32 to index
    %c0_97 = arith.constant 0 : index
    %c0_98 = arith.constant 0 : index
    %189 = vector.load %arg9[%188, %c0_97, %c0_98] : memref<8x8x256xf32, #tpu.memory_space<vmem>>, vector<1x8x256xf32>
    %190 = vector.shape_cast %189 : vector<1x8x256xf32> to vector<8x256xf32>
    %191 = vector.extract_strided_slice %190 {offsets = [0, 0], sizes = [8, 128], strides = [1, 1]} : vector<8x256xf32> to vector<8x128xf32>
    %c0_99 = arith.constant 0 : index
    %c0_100 = arith.constant 0 : index
    %192 = vector.load %arg4[%c0_99, %c0_100] : memref<128x128xf32, #tpu.memory_space<vmem>>, vector<128x128xf32>
    %cst_101 = arith.constant dense<0.000000e+00> : vector<8x128xf32>
    %193 = tpu.matmul %169, %192, %cst_101 {dimension_numbers = #tpu.dot_dimension_numbers<[1], [0], [0], [1], [0, 0, 1, 1], [], []>} : vector<8x128xf32>, vector<128x128xf32>, vector<8x128xf32> -> vector<8x128xf32>
    %194 = arith.addf %191, %193 : vector<8x128xf32>
    %195 = vector.extract_strided_slice %190 {offsets = [0, 128], sizes = [8, 128], strides = [1, 1]} : vector<8x256xf32> to vector<8x128xf32>
    %c0_102 = arith.constant 0 : index
    %c0_103 = arith.constant 0 : index
    %196 = vector.load %arg5[%c0_102, %c0_103] : memref<128x128xf32, #tpu.memory_space<vmem>>, vector<128x128xf32>
    %cst_104 = arith.constant dense<0.000000e+00> : vector<8x128xf32>
    %197 = tpu.matmul %169, %196, %cst_104 {dimension_numbers = #tpu.dot_dimension_numbers<[1], [0], [0], [1], [0, 0, 1, 1], [], []>} : vector<8x128xf32>, vector<128x128xf32>, vector<8x128xf32> -> vector<8x128xf32>
    %198 = arith.addf %195, %197 : vector<8x128xf32>
    %cst_105 = arith.constant dense<0xFF800000> : vector<8xf32>
    %199 = vector.multi_reduction <maximumf>, %198, %cst_105 [1] : vector<8x128xf32> to vector<8xf32>
    %200 = vector.shape_cast %199 : vector<8xf32> to vector<8x1xf32>
    %201 = vector.broadcast %200 : vector<8x1xf32> to vector<8x128xf32>
    %202 = arith.subf %198, %201 : vector<8x128xf32>
    %203 = math.exp %202 : vector<8x128xf32>
    %cst_106 = arith.constant dense<0.000000e+00> : vector<8xf32>
    %204 = vector.multi_reduction <add>, %203, %cst_106 [1] : vector<8x128xf32> to vector<8xf32>
    %205 = vector.shape_cast %204 : vector<8xf32> to vector<8x1xf32>
    %206 = math.log %205 : vector<8x1xf32>
    %207 = vector.broadcast %206 : vector<8x1xf32> to vector<8x128xf32>
    %208 = arith.subf %202, %207 : vector<8x128xf32>
    %209 = arith.index_cast %c7_i32 : i32 to index
    %c0_107 = arith.constant 0 : index
    %c0_108 = arith.constant 0 : index
    %210 = vector.load %arg7[%209, %c0_107, %c0_108] : memref<8x8x128xf32, #tpu.memory_space<vmem>>, vector<1x8x128xf32>
    %211 = vector.shape_cast %210 : vector<1x8x128xf32> to vector<8x128xf32>
    %212 = vector.shape_cast %208 : vector<8x128xf32> to vector<1x8x128xf32>
    tpu.vector_store %arg7[%209, %c0_107, %c0_108], %212 {strides = array<i32>} : memref<8x8x128xf32, #tpu.memory_space<vmem>>, vector<1x8x128xf32>,
    %c8_i32 = arith.constant 8 : i32
    %c0_109 = arith.constant 0 : index
    %c0_110 = arith.constant 0 : index
    %213 = vector.load %arg8[%c0_109, %c0_110] : memref<8x128xf32, #tpu.memory_space<vmem>>, vector<8x128xf32>
    tpu.vector_store %arg8[%c0_109, %c0_110], %194 {strides = array<i32>} : memref<8x128xf32, #tpu.memory_space<vmem>>, vector<8x128xf32>,
    return
  }
  func.func @transform_0(%arg0: i32) -> (i32, i32, i32) {
    %c0_i32 = arith.constant 0 : i32
    %c0_i32_0 = arith.constant 0 : i32
    %c0_i32_1 = arith.constant 0 : i32
    return %arg0, %c0_i32, %c0_i32_0 : i32, i32, i32
  }
  func.func @transform_1(%arg0: i32) -> (i32, i32) {
    %c0_i32 = arith.constant 0 : i32
    %c0_i32_0 = arith.constant 0 : i32
    %c0_i32_1 = arith.constant 0 : i32
    return %c0_i32, %c0_i32_0 : i32, i32
  }
  func.func @transform_2(%arg0: i32) -> (i32, i32) {
    %c0_i32 = arith.constant 0 : i32
    %c0_i32_0 = arith.constant 0 : i32
    %c0_i32_1 = arith.constant 0 : i32
    return %c0_i32, %c0_i32_0 : i32, i32
  }
  func.func @transform_3(%arg0: i32) -> (i32, i32) {
    %c0_i32 = arith.constant 0 : i32
    %c0_i32_0 = arith.constant 0 : i32
    %c0_i32_1 = arith.constant 0 : i32
    return %c0_i32, %c0_i32_0 : i32, i32
  }
  func.func @transform_4(%arg0: i32) -> (i32, i32) {
    %c0_i32 = arith.constant 0 : i32
    %c0_i32_0 = arith.constant 0 : i32
    %c0_i32_1 = arith.constant 0 : i32
    return %c0_i32, %c0_i32_0 : i32, i32
  }
  func.func @transform_5(%arg0: i32) -> (i32, i32) {
    %c0_i32 = arith.constant 0 : i32
    %c0_i32_0 = arith.constant 0 : i32
    %c0_i32_1 = arith.constant 0 : i32
    return %c0_i32, %c0_i32_0 : i32, i32
  }
  func.func @transform_6(%arg0: i32) -> (i32, i32, i32) {
    %c0_i32 = arith.constant 0 : i32
    %c0_i32_0 = arith.constant 0 : i32
    %c0_i32_1 = arith.constant 0 : i32
    return %arg0, %c0_i32, %c0_i32_0 : i32, i32, i32
  }
  func.func @transform_7(%arg0: i32) -> (i32, i32) {
    %c0_i32 = arith.constant 0 : i32
    %c0_i32_0 = arith.constant 0 : i32
    %c0_i32_1 = arith.constant 0 : i32
    return %c0_i32, %c0_i32_0 : i32, i32
  }
}

</mosaic_0001>

<bundles_post_ra>
// kernel: rnn_forward_packed.1
= control target key start
LH: loop header
LB: loop body
LE: loop exit
PB: predicated region body
PF: predicated region fallthrough
CT: control target
= control target key end

     0   :  { %13 = vsyncpa [#allocation4], 0  ;;  %s3639_s0 = inlined_call_operand.vmem [shape: f32[8,8,16], index: 0, kind: input, shape index: {}]   ;;  %s3640_s1 = inlined_call_operand.vmem [shape: f32[8,128], index: 1, kind: input, shape index: {}]   ;;  %s3641_s2 = inlined_call_operand.vmem [shape: f32[16,256], index: 2, kind: input, shape index: {}]   ;;  %s3642_s3 = inlined_call_operand.hbm [shape: f32[128,128], index: 3, kind: input, shape index: {}]   ;;  %s3643_s4 = inlined_call_operand.hbm [shape: f32[128,128], index: 4, kind: input, shape index: {}]   ;;  %s3644_s5 = inlined_call_operand.vmem [shape: f32[1,256], index: 5, kind: input, shape index: {}]   ;;  %s3645_s6 = inlined_call_operand.vmem [shape: f32[8,8,128], index: 6, kind: output, shape index: {0}]   ;;  %s3646_s7 = inlined_call_operand.vmem [shape: f32[8,128], index: 7, kind: output, shape index: {1}]  }
   0x1   :  { %14 = vsyncpa [#allocation6], 0  ;;  %s3081_s24 = smov [#allocation3]   ;;  %s3033_s28 = scalar_lea.hbm %s3642_s3, 2048 }
   0x2   :  { %s26_s25 = sshll.u32 %s3081_s24, 4  ;;  %p3034_p0 = scmp.ne.s32.totalorder %s3642_s3, %s3033_s28  ;;  %s27_s25 = int_to_ptr.vmem [resolvable:$true] %s26_s25 }
   0x3   :  { %p3037_p1 = scmp.lt.u32.totalorder %s3033_s28, %s3642_s3 }
   0x5   :  { %p3039_p2 = pnand %p3037_p1, %p3034_p0 }
   0x7   :  { %3042 = shalt.err (!%p3039_p2)
}
   0x8   :  { %s3043_s10 = scalar_lea.vmem %s27_s25, 2048  ;;  %p3048_p4 = scmp.lt.s32.totalorder %s27_s25, %s27_s25 }
   0x9   :  { %p3044_p3 = scmp.ne.s32.totalorder %s27_s25, %s3043_s10  ;;  %p3049_p5 = scmp.lt.s32.totalorder %s3043_s10, %s3043_s10 }
   0xb   :  { %p3050_p6 = por %p3049_p5, %p3048_p4 }
   0xd   :  { %p3051_p7 = pnand %p3050_p6, %p3044_p3 }
   0xf   :  { %3054 = shalt.err (!%p3051_p7)
}
  0x10   :  { %s3082_s11 = smov 128   ;;  %s3083_s12 = smov 8  }
  0x11   :  { %32 = dma.hbm_to_vmem [thread:$0]  %s3642_s3, 2048, %s27_s25, [#allocation4], %s3082_s11, %s3082_s11, %s3083_s12  }
  0x12   :  { %s3084_s15 = smov [#allocation5]   ;;  %s3055_s19 = scalar_lea.hbm %s3643_s4, 2048 }
  0x13   :  { %s38_s16 = sshll.u32 %s3084_s15, 4  ;;  %p3056_p8 = scmp.ne.s32.totalorder %s3643_s4, %s3055_s19  ;;  %s39_s16 = int_to_ptr.vmem [resolvable:$true] %s38_s16 }
  0x14   :  { %p3059_p9 = scmp.lt.u32.totalorder %s3055_s19, %s3643_s4 }
  0x16   :  { %p3061_p10 = pnand %p3059_p9, %p3056_p8 }
  0x18   :  { %3064 = shalt.err (!%p3061_p10)
}
  0x19   :  { %s3065_s24 = scalar_lea.vmem %s39_s16, 2048  ;;  %p3070_p12 = scmp.lt.s32.totalorder %s39_s16, %s39_s16 }
  0x1a   :  { %p3066_p11 = scmp.ne.s32.totalorder %s39_s16, %s3065_s24  ;;  %p3071_p13 = scmp.lt.s32.totalorder %s3065_s24, %s3065_s24 }
  0x1c   :  { %p3072_p0 = por %p3071_p13, %p3070_p12 }
  0x1e   :  { %p3073_p1 = pnand %p3072_p0, %p3066_p11 }
  0x20   :  { %3076 = shalt.err (!%p3073_p1)
}
  0x21   :  { %44 = dma.hbm_to_vmem [thread:$0]  %s3643_s4, 2048, %s39_s16, [#allocation6], %s3082_s11, %s3082_s11, %s3083_s12  }
  0x22   :  { %3077 = dma.done.wait [#allocation4], 2048  }
  0x23   :  { %3078 = vsyncadd [#allocation4], 4294965248 }
  0x24   :  { %3079 = dma.done.wait [#allocation6], 2048  }
  0x25   :  { %3080 = vsyncadd [#allocation6], 4294965248  ;;  %v3085_v0 = vmov 0.0|0.0   ;;  %v3086_v1 = vmov 0.0   ;;  %vm3087_vm0 = vmmov 0   ;;  %v68_v2 = vld [vmem:[%s3641_s2 + $0x8] sm:$0xff] }
  0x26   :  { %2610 = vmatprep.subr.bf16.mxu1 %v3085_v0  ;;  %172 = vmatprep.mubr.f32.mxu0 %v3086_v1  ;;  %v70_v3 = vld [vmem:[%s3641_s2 + $0x18] sm:$0xff]  ;;  %v240_v4 = vld [vmem:[#allocation3] sm:$0xff]  ;;  %v241_v6 = vld [vmem:[#allocation3 + $0x8] sm:$0xff]  ;;  %vm83_vm1 = vcmask 130048  }
  0x27   :  { %2078 = vmatprep.mubr.msk.f32.mxu1 %vm3087_vm0, %v3086_v1  ;;  %v2606_v5 = vpack.c.bf16 %v70_v3, %v68_v2  ;;  %v67_v7 = vld [vmem:[%s3641_s2] sm:$0xff]  ;;  %v69_v8 = vld [vmem:[%s3641_s2 + $0x10] sm:$0xff]  ;;  %v3168_v9 = vpack.c.bf16 %v241_v6, %v240_v4  ;;  %v243_v12 = vld [vmem:[#allocation3 + $0x18] sm:$0xff]  ;;  %v73_v3 = vlaneseq }
  0x28   :  { %v2608_v10 = vpack.c.bf16 %v69_v8, %v67_v7  ;;  %v242_v11 = vld [vmem:[#allocation3 + $0x10] sm:$0xff]  ;;  %v327_v13 = vld [vmem:[#allocation5] sm:$0xff]  ;;  %v328_v14 = vld [vmem:[#allocation5 + $0x8] sm:$0xff] }
  0x29   :  { %2607 = vmatprep.subr.bf16.mxu0 %v2606_v5  ;;  %2612 = vmatpush3.bf16.msra.mxu1 %v3168_v9  ;;  %v59_v15 = vld [vmem:[%s3639_s0] sm:$0xff]  ;;  %v3174_v16 = vpack.c.bf16 %v243_v12, %v242_v11  ;;  %v3176_v17 = vpack.c.bf16 %v328_v14, %v327_v13  ;;  %v245_v19 = vld [vmem:[#allocation3 + $0x28] sm:$0xff]  ;;  %v329_v20 = vld [vmem:[#allocation5 + $0x10] sm:$0xff]  ;;  %v74_v4 = vshrl.u32 %v73_v3, 7 }
  0x2a   :  { %2609 = vmatpush1.bf16.msra.mxu0 %v2608_v10  ;;  %v244_v18 = vld [vmem:[#allocation3 + $0x20] sm:$0xff]  ;;  %2613 = vmatprep.subr.bf16.mxu1 %v3085_v0  ;;  %v330_v21 = vld [vmem:[#allocation5 + $0x18] sm:$0xff]  ;;  %v60_v22 = vld [vmem:[%s3639_s0 + $0x8] sm:$0xff] }
  0x2b   :  { %2634 = vmatprep.subr.bf16.mxu0 %v3085_v0  ;;  %v3186_v23 = vpack.c.bf16 %v245_v19, %v244_v18  ;;  %v3188_v24 = vpack.c.bf16 %v330_v21, %v329_v20  ;;  %v246_v25 = vld [vmem:[#allocation3 + $0x30] sm:$0xff]  ;;  %v247_v26 = vld [vmem:[#allocation3 + $0x38] sm:$0xff]  ;;  %v331_v27 = vld [vmem:[#allocation5 + $0x20] sm:$0xff]  ;;  %v75_v5 = vsub.s32 0, %v74_v4  ;;  %v79_v8 = vsub.s32 1, %v74_v4 }
  0x2c   :  { %v332_v28 = vld [vmem:[#allocation5 + $0x28] sm:$0xff]  ;;  %v61_v29 = vld [vmem:[%s3639_s0 + $0x10] sm:$0xff]  ;;  %v3199_v30 = vpack.c.bf16 %v247_v26, %v246_v25  ;;  %v248_v32 = vld [vmem:[#allocation3 + $0x40] sm:$0xff] }
  0x2d   :  { %1759 = vmatmul.mubr.msk.f32.vlgmr.msra.gmra.mrb[0].mxu0 %vm83_vm1, %v59_v15  ;;  %2615 = vmatpush3.bf16.msra.mxu1 %v3174_v16  ;;  %v3201_v31 = vpack.c.bf16 %v332_v28, %v331_v27  ;;  %v249_v33 = vld [vmem:[#allocation3 + $0x48] sm:$0xff]  ;;  %v333_v34 = vld [vmem:[#allocation5 + $0x30] sm:$0xff]  ;;  %v334_v35 = vld [vmem:[#allocation5 + $0x38] sm:$0xff] }
  0x2e   :  { %2636 = vmatpush3.bf16.msra.mxu0 %v3176_v17  ;;  %178 = vmatprep.mubr.f32.mxu0 %v3086_v1  ;;  %v62_v36 = vld [vmem:[%s3639_s0 + $0x18] sm:$0xff]  ;;  %v3212_v37 = vpack.c.bf16 %v249_v33, %v248_v32  ;;  %v3214_v38 = vpack.c.bf16 %v334_v35, %v333_v34  ;;  %v250_v39 = vld [vmem:[#allocation3 + $0x50] sm:$0xff]  ;;  %v335_v41 = vld [vmem:[#allocation5 + $0x40] sm:$0xff] }
  0x2f   :  { %2616 = vmatprep.subr.bf16.mxu1 %v3085_v0  ;;  %2637 = vmatprep.subr.bf16.mxu0 %v3085_v0  ;;  %v251_v40 = vld [vmem:[#allocation3 + $0x58] sm:$0xff]  ;;  %v336_v42 = vld [vmem:[#allocation5 + $0x48] sm:$0xff]  ;;  %v63_v43 = vld [vmem:[%s3639_s0 + $0x20] sm:$0xff] }
  0x30   :  { %v3225_v44 = vpack.c.bf16 %v251_v40, %v250_v39  ;;  %v3227_v45 = vpack.c.bf16 %v336_v42, %v335_v41  ;;  %v252_v46 = vld [vmem:[#allocation3 + $0x60] sm:$0xff]  ;;  %v253_v47 = vld [vmem:[#allocation3 + $0x68] sm:$0xff]  ;;  %v337_v48 = vld [vmem:[#allocation5 + $0x50] sm:$0xff] }
  0x31   :  { %1760 = vmatmul.mubr.msk.f32.gmra.mrb[2].mxu0 %vm83_vm1, %v60_v22  ;;  %2618 = vmatpush3.bf16.msra.mxu1 %v3186_v23  ;;  %v338_v49 = vld [vmem:[#allocation5 + $0x58] sm:$0xff]  ;;  %v64_v50 = vld [vmem:[%s3639_s0 + $0x28] sm:$0xff]  ;;  %v3238_v51 = vpack.c.bf16 %v253_v47, %v252_v46  ;;  %v254_v53 = vld [vmem:[#allocation3 + $0x70] sm:$0xff] }
  0x32   :  { %2639 = vmatpush3.bf16.msra.mxu0 %v3188_v24  ;;  %184 = vmatprep.mubr.f32.mxu0 %v3086_v1  ;;  %v3240_v52 = vpack.c.bf16 %v338_v49, %v337_v48  ;;  %v255_v54 = vld [vmem:[#allocation3 + $0x78] sm:$0xff]  ;;  %v339_v55 = vld [vmem:[#allocation5 + $0x60] sm:$0xff]  ;;  %v340_v56 = vld [vmem:[#allocation5 + $0x68] sm:$0xff] }
  0x33   :  { %2619 = vmatprep.subr.bf16.mxu1 %v3085_v0  ;;  %2640 = vmatprep.subr.bf16.mxu0 %v3085_v0  ;;  %v65_v57 = vld [vmem:[%s3639_s0 + $0x30] sm:$0xff]  ;;  %v3251_v58 = vpack.c.bf16 %v255_v54, %v254_v53  ;;  %v3253_v59 = vpack.c.bf16 %v340_v56, %v339_v55  ;;  %v342_v61 = vld [vmem:[#allocation5 + $0x78] sm:$0xff]  ;;  %v57_v62 = vld [vmem:[%s3640_s1] sm:$0xff] }
  0x34   :  { %v341_v60 = vld [vmem:[#allocation5 + $0x70] sm:$0xff]  ;;  %v66_v63 = vld [vmem:[%s3639_s0 + $0x38] sm:$0xff]  ;;  %v71_v6 = vld [vmem:[%s3644_s5] sm:$0x3] }
  0x35   :  { %1761 = vmatmul.mubr.msk.f32.gmra.mrb[4].mxu0 %vm83_vm1, %v61_v29  ;;  %2621 = vmatpush3.bf16.msra.mxu1 %v3199_v30  ;;  %v3267_v2 = vpack.c.bf16 %v342_v61, %v341_v60  ;;  %v76_v11 = vrot.slane %v71_v6, %v75_v5  ;;  %v80_v12 = vrot.slane %v71_v6, %v79_v8 }
  0x36   :  { %2642 = vmatpush3.bf16.msra.mxu0 %v3201_v31  ;;  %190 = vmatprep.mubr.f32.mxu0 %v3086_v1 }
  0x37   :  { %2622 = vmatprep.subr.bf16.mxu1 %v3085_v0  ;;  %2643 = vmatprep.subr.bf16.mxu0 %v3085_v0 }
  0x39   :  { %1762 = vmatmul.mubr.msk.f32.gmra.mrb[6].mxu0 %vm83_vm1, %v62_v36  ;;  %2624 = vmatpush3.bf16.msra.mxu1 %v3212_v37 }
  0x3a   :  { %2645 = vmatpush3.bf16.msra.mxu0 %v3214_v38  ;;  %196 = vmatprep.mubr.f32.mxu0 %v3086_v1 }
  0x3b   :  { %2625 = vmatprep.subr.bf16.mxu1 %v3085_v0  ;;  %2646 = vmatprep.subr.bf16.mxu0 %v3085_v0 }
  0x3d   :  { %1763 = vmatmul.mubr.msk.f32.gmra.mrb[8].mxu0 %vm83_vm1, %v63_v43  ;;  %2627 = vmatpush3.bf16.msra.mxu1 %v3225_v44 }
  0x3e   :  { %2648 = vmatpush3.bf16.msra.mxu0 %v3227_v45  ;;  %202 = vmatprep.mubr.f32.mxu0 %v3086_v1 }
  0x3f   :  { %2628 = vmatprep.subr.bf16.mxu1 %v3085_v0  ;;  %2649 = vmatprep.subr.bf16.mxu0 %v3085_v0 }
  0x41   :  { %1764 = vmatmul.mubr.msk.f32.gmra.mrb[10].mxu0 %vm83_vm1, %v64_v50  ;;  %2630 = vmatpush3.bf16.msra.mxu1 %v3238_v51 }
  0x42   :  { %2651 = vmatpush3.bf16.msra.mxu0 %v3240_v52  ;;  %208 = vmatprep.mubr.f32.mxu0 %v3086_v1 }
  0x43   :  { %2631 = vmatprep.subr.bf16.mxu1 %v3085_v0  ;;  %2652 = vmatprep.subr.bf16.mxu0 %v3085_v0 }
  0x45   :  { %1765 = vmatmul.mubr.msk.f32.gmra.mrb[12].mxu0 %vm83_vm1, %v65_v57  ;;  %2633 = vmatpush3.bf16.msra.mxu1 %v3251_v58 }
  0x46   :  { %2654 = vmatpush3.bf16.msra.mxu0 %v3253_v59  ;;  %214 = vmatprep.mubr.f32.mxu0 %v3086_v1 }
  0x47   :  { %2655 = vmatprep.subr.bf16.mxu0 %v3085_v0  ;;  %2658 = vmatprep.subr.bf16.mxu1 %v3085_v0 }
  0x48   :  { %2079 = vmatmul.mubr.f32.vlgmr.msra.gmra.mrb[0].mxu1 %v57_v62 }
  0x49   :  { %1766 = vmatmul.mubr.msk.f32.gmra.mrb[14].mxu0 %vm83_vm1, %v66_v63  ;;  %2660 = vmatpush3.bf16.msra.mxu1 %v3168_v9 }
  0x4a   :  { %2657 = vmatpush3.bf16.msra.mxu0 %v3267_v2  ;;  %2113 = vmatprep.mubr.msk.f32.mxu0 %vm3087_vm0, %v3086_v1 }
  0x4b   :  { %2682 = vmatprep.subr.bf16.mxu0 %v3085_v0  ;;  %2661 = vmatprep.subr.bf16.mxu1 %v3085_v0 }
  0x4c   :  { %2148 = vmatprep.mubr.msk.f32.mxu1 %vm3087_vm0, %v3086_v1 }
  0x4d   :  { %2114 = vmatmul.mubr.f32.vlgmr.msra.gmra.mrb[16].mxu0 %v57_v62  ;;  %2663 = vmatpush3.bf16.msra.mxu1 %v3174_v16 }
  0x4e   :  { %2684 = vmatpush3.bf16.msra.mxu0 %v3176_v17  ;;  %2183 = vmatprep.mubr.msk.f32.mxu0 %vm3087_vm0, %v3086_v1 }
  0x4f   :  { %2685 = vmatprep.subr.bf16.mxu0 %v3085_v0  ;;  %2664 = vmatprep.subr.bf16.mxu1 %v3085_v0 }
  0x51   :  { %2666 = vmatpush3.bf16.msra.mxu1 %v3186_v23 }
  0x52   :  { %2687 = vmatpush3.bf16.msra.mxu0 %v3188_v24  ;;  %2667 = vmatprep.subr.bf16.mxu1 %v3085_v0 }
  0x53   :  { %2688 = vmatprep.subr.bf16.mxu0 %v3085_v0 }
  0x55   :  { %2669 = vmatpush3.bf16.msra.mxu1 %v3199_v30 }
  0x56   :  { %2690 = vmatpush3.bf16.msra.mxu0 %v3201_v31  ;;  %2670 = vmatprep.subr.bf16.mxu1 %v3085_v0 }
  0x57   :  { %2691 = vmatprep.subr.bf16.mxu0 %v3085_v0 }
  0x59   :  { %2672 = vmatpush3.bf16.msra.mxu1 %v3212_v37 }
  0x5a   :  { %2693 = vmatpush3.bf16.msra.mxu0 %v3214_v38  ;;  %2673 = vmatprep.subr.bf16.mxu1 %v3085_v0 }
  0x5b   :  { %2694 = vmatprep.subr.bf16.mxu0 %v3085_v0 }
  0x5d   :  { %2675 = vmatpush3.bf16.msra.mxu1 %v3225_v44 }
  0x5e   :  { %2696 = vmatpush3.bf16.msra.mxu0 %v3227_v45  ;;  %2676 = vmatprep.subr.bf16.mxu1 %v3085_v0 }
  0x5f   :  { %2697 = vmatprep.subr.bf16.mxu0 %v3085_v0 }
  0x61   :  { %2678 = vmatpush3.bf16.msra.mxu1 %v3238_v51 }
  0x62   :  { %2699 = vmatpush3.bf16.msra.mxu0 %v3240_v52  ;;  %2679 = vmatprep.subr.bf16.mxu1 %v3085_v0 }
  0x63   :  { %2700 = vmatprep.subr.bf16.mxu0 %v3085_v0 }
  0x65   :  { %2681 = vmatpush3.bf16.msra.mxu1 %v3251_v58 }
  0x66   :  { %2702 = vmatpush3.bf16.msra.mxu0 %v3253_v59  ;;  %2706 = vmatprep.subr.bf16.mxu1 %v3085_v0 }
  0x67   :  { %2703 = vmatprep.subr.bf16.mxu0 %v3085_v0 }
  0x6a   :  { %2705 = vmatpush3.bf16.msra.mxu0 %v3267_v2 }
  0x6b   :  { %2730 = vmatprep.subr.bf16.mxu0 %v3085_v0 }
 0x100   :  { %v174_v7 = vpop.f32.mrb[0].mxu0 }
 0x101   :  { %v176_v10 = vpop.f32.mrb[1].mxu0  ;;  %v175_v42 = vadd.f32 %v174_v7, %v76_v11 }
 0x102   :  { %v177_v57 = vadd.f32 %v176_v10, %v80_v12 }
 0x104   :  { %v180_v13 = vpop.f32.mrb[2].mxu0 }
 0x105   :  { %v3316_v14 = vadd.f32 %v180_v13, %v76_v11  ;;  %v182_v15 = vpop.f32.mrb[3].mxu0 }
 0x106   :  { %v3318_v18 = vadd.f32 %v182_v15, %v80_v12  ;;  %v1187_v15 = vld [vmem:[#allocation3 + $0x18] sm:$0xff] }
 0x108   :  { %v186_v19 = vpop.f32.mrb[4].mxu0 }
 0x109   :  { %v3320_v20 = vadd.f32 %v186_v19, %v76_v11  ;;  %v188_v21 = vpop.f32.mrb[5].mxu0  ;;  %v1273_v19 = vld [vmem:[#allocation5 + $0x10] sm:$0xff] }
 0x10a   :  { %v3322_v22 = vadd.f32 %v188_v21, %v80_v12 }
 0x10c   :  { %v192_v25 = vpop.f32.mrb[6].mxu0 }
 0x10d   :  { %v3324_v26 = vadd.f32 %v192_v25, %v76_v11  ;;  %v194_v27 = vpop.f32.mrb[7].mxu0  ;;  %v1188_v25 = vld [vmem:[#allocation3 + $0x20] sm:$0xff] }
 0x10e   :  { %v3326_v28 = vadd.f32 %v194_v27, %v80_v12  ;;  %v1275_v27 = vld [vmem:[#allocation5 + $0x20] sm:$0xff] }
 0x110   :  { %v198_v29 = vpop.f32.mrb[8].mxu0 }
 0x111   :  { %v3328_v32 = vadd.f32 %v198_v29, %v76_v11  ;;  %v200_v33 = vpop.f32.mrb[9].mxu0 }
 0x112   :  { %v3330_v34 = vadd.f32 %v200_v33, %v80_v12 }
 0x114   :  { %v204_v35 = vpop.f32.mrb[10].mxu0 }
 0x115   :  { %v3332_v36 = vadd.f32 %v204_v35, %v76_v11  ;;  %v206_v39 = vpop.f32.mrb[11].mxu0  ;;  %v1190_v35 = vld [vmem:[#allocation3 + $0x30] sm:$0xff] }
 0x116   :  { %v3334_v40 = vadd.f32 %v206_v39, %v80_v12  ;;  %v1191_v39 = vld [vmem:[#allocation3 + $0x38] sm:$0xff] }
 0x118   :  { %v210_v41 = vpop.f32.mrb[12].mxu0 }
 0x119   :  { %v3336_v43 = vadd.f32 %v210_v41, %v76_v11  ;;  %v212_v46 = vpop.f32.mrb[13].mxu0  ;;  %v1277_v41 = vld [vmem:[#allocation5 + $0x30] sm:$0xff] }
 0x11a   :  { %v3338_v47 = vadd.f32 %v212_v46, %v80_v12  ;;  %v3495_v46 = vpack.c.bf16 %v1191_v39, %v1190_v35 }
 0x11b   :  { %v322_v48 = vpop.f32.mrb[0].mxu1 }
 0x11c   :  { %v216_v49 = vpop.f32.mrb[14].mxu0  ;;  %v326_v50 = vadd.f32 %v322_v48, %v175_v42  ;;  %v2080_v53 = vpop.f32.mrb[1].mxu1  ;;  %v1278_v42 = vld [vmem:[#allocation5 + $0x38] sm:$0xff] }
 0x11d   :  { %v3340_v54 = vadd.f32 %v216_v49, %v76_v11  ;;  %v218_v55 = vpop.f32.mrb[15].mxu0  ;;  %v3499_v48 = vpack.c.bf16 %v1278_v42, %v1277_v41  ;;  %v1192_v49 = vld [vmem:[#allocation3 + $0x40] sm:$0xff] }
 0x11e   :  { %v3342_v56 = vadd.f32 %v218_v55, %v80_v12  ;;  %2149 = vmatmul.mubr.f32.vlgmr.msra.gmra.mrb[2].mxu1 %v326_v50  ;;  %2184 = vmatmul.mubr.f32.vlgmr.msra.gmra.mrb[18].mxu0 %v326_v50  ;;  %v1193_v50 = vld [vmem:[#allocation3 + $0x48] sm:$0xff]  ;;  %v1194_v55 = vld [vmem:[#allocation3 + $0x50] sm:$0xff] }
 0x11f   :  { %2708 = vmatpush3.bf16.msra.mxu1 %v3168_v9  ;;  %2732 = vmatpush3.bf16.msra.mxu0 %v3176_v17  ;;  %v3503_v53 = vpack.c.bf16 %v1193_v50, %v1192_v49 }
 0x120   :  { %v409_v60 = vpop.f32.mrb[16].mxu0  ;;  %2709 = vmatprep.subr.bf16.mxu1 %v3085_v0  ;;  %2733 = vmatprep.subr.bf16.mxu0 %v3085_v0 }
 0x121   :  { %v3346_v61 = vadd.f32 %v409_v60, %v177_v57  ;;  %v2115_v62 = vpop.f32.mrb[17].mxu0  ;;  %2218 = vmatprep.mubr.msk.f32.mxu1 %vm3087_vm0, %v3086_v1  ;;  %2253 = vmatprep.mubr.msk.f32.mxu0 %vm3087_vm0, %v3086_v1  ;;  %v1195_v57 = vld [vmem:[#allocation3 + $0x58] sm:$0xff] }
 0x122   :  { %v3509_v60 = vpack.c.bf16 %v1195_v57, %v1194_v55  ;;  %v1196_v62 = vld [vmem:[#allocation3 + $0x60] sm:$0xff] }
 0x123   :  { %414 = vmax.xlane.f32.xlu0 %v3346_v61  ;;  %2711 = vmatpush3.bf16.msra.mxu1 %v3174_v16 }
 0x124   :  { %2735 = vmatpush3.bf16.msra.mxu0 %v3188_v24  ;;  %2712 = vmatprep.subr.bf16.mxu1 %v3085_v0 }
 0x125   :  { %2736 = vmatprep.subr.bf16.mxu0 %v3085_v0 }
 0x127   :  { %2714 = vmatpush3.bf16.msra.mxu1 %v3186_v23 }
 0x128   :  { %2738 = vmatpush3.bf16.msra.mxu0 %v3201_v31  ;;  %2715 = vmatprep.subr.bf16.mxu1 %v3085_v0 }
 0x129   :  { %2739 = vmatprep.subr.bf16.mxu0 %v3085_v0 }
 0x12b   :  { %2717 = vmatpush3.bf16.msra.mxu1 %v3199_v30 }
 0x12c   :  { %2741 = vmatpush3.bf16.msra.mxu0 %v3214_v38  ;;  %2718 = vmatprep.subr.bf16.mxu1 %v3085_v0 }
 0x12d   :  { %2742 = vmatprep.subr.bf16.mxu0 %v3085_v0 }
 0x12f   :  { %2720 = vmatpush3.bf16.msra.mxu1 %v3212_v37 }
 0x130   :  { %2744 = vmatpush3.bf16.msra.mxu0 %v3227_v45  ;;  %2721 = vmatprep.subr.bf16.mxu1 %v3085_v0 }
 0x131   :  { %2745 = vmatprep.subr.bf16.mxu0 %v3085_v0 }
 0x133   :  { %2723 = vmatpush3.bf16.msra.mxu1 %v3225_v44 }
 0x134   :  { %2747 = vmatpush3.bf16.msra.mxu0 %v3240_v52  ;;  %2724 = vmatprep.subr.bf16.mxu1 %v3085_v0 }
 0x135   :  { %2748 = vmatprep.subr.bf16.mxu0 %v3085_v0 }
 0x137   :  { %2726 = vmatpush3.bf16.msra.mxu1 %v3238_v51 }
 0x138   :  { %2750 = vmatpush3.bf16.msra.mxu0 %v3253_v59  ;;  %2727 = vmatprep.subr.bf16.mxu1 %v3085_v0 }
 0x139   :  { %2751 = vmatprep.subr.bf16.mxu0 %v3085_v0 }
 0x13b   :  { %2729 = vmatpush3.bf16.msra.mxu1 %v3251_v58 }
 0x13c   :  { %2753 = vmatpush3.bf16.msra.mxu0 %v3267_v2  ;;  %2754 = vmatprep.subr.bf16.mxu1 %v3085_v0 }
 0x13d   :  { %2778 = vmatprep.subr.bf16.mxu0 %v3085_v0 }
 0x1f1   :  { %v510_v63 = vpop.f32.mrb[2].mxu1  ;;  %v597_v3 = vpop.f32.mrb[18].mxu0 }
 0x1f2   :  { %v514_v4 = vadd.f32 %v510_v63, %v3316_v14  ;;  %v3385_v5 = vadd.f32 %v597_v3, %v3318_v18  ;;  %v2150_v6 = vpop.f32.mrb[3].mxu1  ;;  %v2185_v7 = vpop.f32.mrb[19].mxu0  ;;  %v1197_v63 = vld [vmem:[#allocation3 + $0x68] sm:$0xff] }
 0x1f3   :  { %v3515_v3 = vpack.c.bf16 %v1197_v63, %v1196_v62 }
 0x1f4   :  { %602 = vmax.xlane.f32.xlu0 %v3385_v5  ;;  %2219 = vmatmul.mubr.f32.vlgmr.msra.gmra.mrb[4].mxu1 %v514_v4 }
 0x1f5   :  { %2254 = vmatmul.mubr.f32.vlgmr.msra.gmra.mrb[20].mxu0 %v514_v4  ;;  %2756 = vmatpush3.bf16.msra.mxu1 %v3168_v9  ;;  %v1199_v4 = vld [vmem:[#allocation3 + $0x78] sm:$0xff] }
 0x1f6   :  { %2780 = vmatpush3.bf16.msra.mxu0 %v3176_v17  ;;  %2757 = vmatprep.subr.bf16.mxu1 %v3085_v0 }
 0x1f7   :  { %2781 = vmatprep.subr.bf16.mxu0 %v3085_v0  ;;  %2288 = vmatprep.mubr.msk.f32.mxu1 %vm3087_vm0, %v3086_v1 }
 0x1f8   :  { %2323 = vmatprep.mubr.msk.f32.mxu0 %vm3087_vm0, %v3086_v1 }
 0x1f9   :  { %2759 = vmatpush3.bf16.msra.mxu1 %v3174_v16 }
 0x1fa   :  { %2783 = vmatpush3.bf16.msra.mxu0 %v3188_v24  ;;  %2760 = vmatprep.subr.bf16.mxu1 %v3085_v0 }
 0x1fb   :  { %2784 = vmatprep.subr.bf16.mxu0 %v3085_v0 }
 0x1fd   :  { %2762 = vmatpush3.bf16.msra.mxu1 %v3186_v23 }
 0x1fe   :  { %2786 = vmatpush3.bf16.msra.mxu0 %v3201_v31  ;;  %2763 = vmatprep.subr.bf16.mxu1 %v3085_v0 }
 0x1ff   :  { %2787 = vmatprep.subr.bf16.mxu0 %v3085_v0 }
 0x201   :  { %2765 = vmatpush3.bf16.msra.mxu1 %v3199_v30 }
 0x202   :  { %2789 = vmatpush3.bf16.msra.mxu0 %v3214_v38  ;;  %2766 = vmatprep.subr.bf16.mxu1 %v3085_v0 }
 0x203   :  { %2790 = vmatprep.subr.bf16.mxu0 %v3085_v0 }
 0x205   :  { %2768 = vmatpush3.bf16.msra.mxu1 %v3212_v37 }
 0x206   :  { %2792 = vmatpush3.bf16.msra.mxu0 %v3227_v45  ;;  %2769 = vmatprep.subr.bf16.mxu1 %v3085_v0 }
 0x207   :  { %2793 = vmatprep.subr.bf16.mxu0 %v3085_v0 }
 0x209   :  { %2771 = vmatpush3.bf16.msra.mxu1 %v3225_v44 }
 0x20a   :  { %2795 = vmatpush3.bf16.msra.mxu0 %v3240_v52  ;;  %2772 = vmatprep.subr.bf16.mxu1 %v3085_v0 }
 0x20b   :  { %2796 = vmatprep.subr.bf16.mxu0 %v3085_v0 }
 0x20d   :  { %2774 = vmatpush3.bf16.msra.mxu1 %v3238_v51 }
 0x20e   :  { %2798 = vmatpush3.bf16.msra.mxu0 %v3253_v59  ;;  %2775 = vmatprep.subr.bf16.mxu1 %v3085_v0 }
 0x20f   :  { %2799 = vmatprep.subr.bf16.mxu0 %v3085_v0 }
 0x211   :  { %2777 = vmatpush3.bf16.msra.mxu1 %v3251_v58 }
 0x212   :  { %2801 = vmatpush3.bf16.msra.mxu0 %v3267_v2  ;;  %2802 = vmatprep.subr.bf16.mxu1 %v3085_v0 }
 0x213   :  { %2826 = vmatprep.subr.bf16.mxu0 %v3085_v0 }
 0x2c7   :  { %v699_v8 = vpop.f32.mrb[4].mxu1 }
 0x2c8   :  { %v703_v10 = vadd.f32 %v699_v8, %v3320_v20  ;;  %v786_v11 = vpop.f32.mrb[20].mxu0  ;;  %v2220_v12 = vpop.f32.mrb[5].mxu1  ;;  %v1274_v20 = vld [vmem:[#allocation5 + $0x18] sm:$0xff] }
 0x2c9   :  { %v3426_v13 = vadd.f32 %v786_v11, %v3322_v22  ;;  %v2255_v14 = vpop.f32.mrb[21].mxu0  ;;  %v3483_v22 = vpack.c.bf16 %v1274_v20, %v1273_v19 }
 0x2ca   :  { %2289 = vmatmul.mubr.f32.vlgmr.msra.gmra.mrb[6].mxu1 %v703_v10  ;;  %2324 = vmatmul.mubr.f32.vlgmr.msra.gmra.mrb[22].mxu0 %v703_v10  ;;  %v1471_v14 = vld [vmem:[#allocation5 + $0x58] sm:$0xff] }
 0x2cb   :  { %791 = vmax.xlane.f32.xlu1 %v3426_v13  ;;  %2804 = vmatpush3.bf16.msra.mxu1 %v3168_v9 }
 0x2cc   :  { %2828 = vmatpush3.bf16.msra.mxu0 %v3176_v17  ;;  %2805 = vmatprep.subr.bf16.mxu1 %v3085_v0 }
 0x2cd   :  { %2829 = vmatprep.subr.bf16.mxu0 %v3085_v0  ;;  %2358 = vmatprep.mubr.msk.f32.mxu1 %vm3087_vm0, %v3086_v1 }
 0x2ce   :  { %2393 = vmatprep.mubr.msk.f32.mxu0 %vm3087_vm0, %v3086_v1 }
 0x2cf   :  { %2807 = vmatpush3.bf16.msra.mxu1 %v3174_v16 }
 0x2d0   :  { %2831 = vmatpush3.bf16.msra.mxu0 %v3188_v24  ;;  %2808 = vmatprep.subr.bf16.mxu1 %v3085_v0 }
 0x2d1   :  { %2832 = vmatprep.subr.bf16.mxu0 %v3085_v0 }
 0x2d3   :  { %2810 = vmatpush3.bf16.msra.mxu1 %v3186_v23 }
 0x2d4   :  { %2834 = vmatpush3.bf16.msra.mxu0 %v3201_v31  ;;  %2811 = vmatprep.subr.bf16.mxu1 %v3085_v0  ;;  %v1184_v31 = vld [vmem:[#allocation3] sm:$0xff] }
 0x2d5   :  { %2835 = vmatprep.subr.bf16.mxu0 %v3085_v0 }
 0x2d7   :  { %2813 = vmatpush3.bf16.msra.mxu1 %v3199_v30 }
 0x2d8   :  { %2837 = vmatpush3.bf16.msra.mxu0 %v3214_v38  ;;  %2814 = vmatprep.subr.bf16.mxu1 %v3085_v0  ;;  %v1271_v38 = vld [vmem:[#allocation5] sm:$0xff] }
 0x2d9   :  { %2838 = vmatprep.subr.bf16.mxu0 %v3085_v0 }
 0x2db   :  { %2816 = vmatpush3.bf16.msra.mxu1 %v3212_v37  ;;  %v1185_v37 = vld [vmem:[#allocation3 + $0x8] sm:$0xff] }
 0x2dc   :  { %2840 = vmatpush3.bf16.msra.mxu0 %v3227_v45  ;;  %2817 = vmatprep.subr.bf16.mxu1 %v3085_v0 }
 0x2dd   :  { %2841 = vmatprep.subr.bf16.mxu0 %v3085_v0 }
 0x2df   :  { %2819 = vmatpush3.bf16.msra.mxu1 %v3225_v44  ;;  %v3474_v44 = vpack.c.bf16 %v1185_v37, %v1184_v31  ;;  %v1475_v31 = vld [vmem:[#allocation5 + $0x78] sm:$0xff] }
 0x2e0   :  { %2843 = vmatpush3.bf16.msra.mxu0 %v3240_v52  ;;  %2820 = vmatprep.subr.bf16.mxu1 %v3085_v0 }
 0x2e1   :  { %2844 = vmatprep.subr.bf16.mxu0 %v3085_v0 }
 0x2e3   :  { %2822 = vmatpush3.bf16.msra.mxu1 %v3238_v51  ;;  %v1272_v51 = vld [vmem:[#allocation5 + $0x8] sm:$0xff] }
 0x2e4   :  { %2846 = vmatpush3.bf16.msra.mxu0 %v3253_v59  ;;  %2823 = vmatprep.subr.bf16.mxu1 %v3085_v0  ;;  %v3476_v18 = vpack.c.bf16 %v1272_v51, %v1271_v38 }
 0x2e5   :  { %2847 = vmatprep.subr.bf16.mxu0 %v3085_v0 }
 0x2e7   :  { %2825 = vmatpush3.bf16.msra.mxu1 %v3251_v58  ;;  %v1186_v58 = vld [vmem:[#allocation3 + $0x10] sm:$0xff] }
 0x2e8   :  { %2849 = vmatpush3.bf16.msra.mxu0 %v3267_v2  ;;  %2850 = vmatprep.subr.bf16.mxu1 %v3085_v0  ;;  %v3479_v21 = vpack.c.bf16 %v1187_v15, %v1186_v58 }
 0x2e9   :  { %2874 = vmatprep.subr.bf16.mxu0 %v3085_v0 }
 0x39d   :  { %v888_v9 = vpop.f32.mrb[6].mxu1  ;;  %v975_v16 = vpop.f32.mrb[22].mxu0 }
 0x39e   :  { %v892_v17 = vadd.f32 %v888_v9, %v3324_v26  ;;  %v3467_v23 = vadd.f32 %v975_v16, %v3326_v28  ;;  %v2290_v24 = vpop.f32.mrb[7].mxu1  ;;  %v2325_v30 = vpop.f32.mrb[23].mxu0  ;;  %v1189_v26 = vld [vmem:[#allocation3 + $0x28] sm:$0xff]  ;;  %v1472_v16 = vld [vmem:[#allocation5 + $0x60] sm:$0xff] }
 0x39f   :  { %v1276_v28 = vld [vmem:[#allocation5 + $0x28] sm:$0xff]  ;;  %v3487_v29 = vpack.c.bf16 %v1189_v26, %v1188_v25  ;;  %v1474_v30 = vld [vmem:[#allocation5 + $0x70] sm:$0xff] }
 0x3a0   :  { %980 = vmax.xlane.f32.xlu1 %v3467_v23  ;;  %2359 = vmatmul.mubr.f32.vlgmr.msra.gmra.mrb[8].mxu1 %v892_v17  ;;  %v3491_v33 = vpack.c.bf16 %v1276_v28, %v1275_v27  ;;  %v2944_v37 = vpack.c.bf16 %v1475_v31, %v1474_v30 }
 0x3a1   :  { %2394 = vmatmul.mubr.f32.vlgmr.msra.gmra.mrb[24].mxu0 %v892_v17  ;;  %2428 = vmatprep.mubr.msk.f32.mxu1 %vm3087_vm0, %v3086_v1  ;;  %v1473_v17 = vld [vmem:[#allocation5 + $0x68] sm:$0xff] }
 0x3a2   :  { %2463 = vmatprep.mubr.msk.f32.mxu0 %vm3087_vm0, %v3086_v1  ;;  %2852 = vmatpush3.bf16.msra.mxu1 %v3474_v44  ;;  %v2941_v24 = vpack.c.bf16 %v1473_v17, %v1472_v16 }
 0x3a3   :  { %2876 = vmatpush3.bf16.msra.mxu0 %v3476_v18  ;;  %2853 = vmatprep.subr.bf16.mxu1 %v3085_v0 }
 0x3a4   :  { %2877 = vmatprep.subr.bf16.mxu0 %v3085_v0 }
 0x3a6   :  { %2855 = vmatpush3.bf16.msra.mxu1 %v3479_v21 }
 0x3a7   :  { %2879 = vmatpush3.bf16.msra.mxu0 %v3483_v22  ;;  %2856 = vmatprep.subr.bf16.mxu1 %v3085_v0 }
 0x3a8   :  { %2880 = vmatprep.subr.bf16.mxu0 %v3085_v0 }
 0x3aa   :  { %2858 = vmatpush3.bf16.msra.mxu1 %v3487_v29 }
 0x3ab   :  { %2882 = vmatpush3.bf16.msra.mxu0 %v3491_v33  ;;  %2859 = vmatprep.subr.bf16.mxu1 %v3085_v0 }
 0x3ac   :  { %2883 = vmatprep.subr.bf16.mxu0 %v3085_v0 }
 0x3ae   :  { %2861 = vmatpush3.bf16.msra.mxu1 %v3495_v46 }
 0x3af   :  { %2885 = vmatpush3.bf16.msra.mxu0 %v3499_v48  ;;  %2862 = vmatprep.subr.bf16.mxu1 %v3085_v0 }
 0x3b0   :  { %2886 = vmatprep.subr.bf16.mxu0 %v3085_v0 }
 0x3b2   :  { %2864 = vmatpush3.bf16.msra.mxu1 %v3503_v53 }
 0x3b3   :  { %2888 = vmatpush3.bf16.msra.mxu0 %v3227_v45  ;;  %2865 = vmatprep.subr.bf16.mxu1 %v3085_v0  ;;  %v1198_v45 = vld [vmem:[#allocation3 + $0x70] sm:$0xff] }
 0x3b4   :  { %2889 = vmatprep.subr.bf16.mxu0 %v3085_v0  ;;  %v3526_v6 = vpack.c.bf16 %v1199_v4, %v1198_v45 }
 0x3b6   :  { %2867 = vmatpush3.bf16.msra.mxu1 %v3509_v60 }
 0x3b7   :  { %2891 = vmatpush3.bf16.msra.mxu0 %v3240_v52  ;;  %2868 = vmatprep.subr.bf16.mxu1 %v3085_v0 }
 0x3b8   :  { %2892 = vmatprep.subr.bf16.mxu0 %v3085_v0 }
 0x3ba   :  { %2870 = vmatpush3.bf16.msra.mxu1 %v3515_v3 }
 0x3bb   :  { %2894 = vmatpush3.bf16.msra.mxu0 %v3253_v59  ;;  %2871 = vmatprep.subr.bf16.mxu1 %v3085_v0 }
 0x3bc   :  { %2895 = vmatprep.subr.bf16.mxu0 %v3085_v0 }
 0x3be   :  { %2873 = vmatpush3.bf16.msra.mxu1 %v3526_v6 }
 0x3bf   :  { %2897 = vmatpush3.bf16.msra.mxu0 %v3267_v2  ;;  %2898 = vmatprep.subr.bf16.mxu1 %v3085_v0  ;;  %v1468_v2 = vld [vmem:[#allocation5 + $0x40] sm:$0xff] }
 0x3c0   :  { %2922 = vmatprep.subr.bf16.mxu0 %v3085_v0 }
 0x473   :  { %v1077_v52 = vpop.f32.mrb[8].mxu1 }
 0x474   :  { %v1081_v7 = vadd.f32 %v1077_v52, %v3328_v32  ;;  %v1164_v59 = vpop.f32.mrb[24].mxu0  ;;  %v2360_v8 = vpop.f32.mrb[9].mxu1  ;;  %v1469_v32 = vld [vmem:[#allocation5 + $0x48] sm:$0xff] }
 0x475   :  { %v3532_v10 = vadd.f32 %v1164_v59, %v3330_v34  ;;  %v2395_v11 = vpop.f32.mrb[25].mxu0  ;;  %v1470_v34 = vld [vmem:[#allocation5 + $0x50] sm:$0xff]  ;;  %v2935_v12 = vpack.c.bf16 %v1469_v32, %v1468_v2 }
 0x476   :  { %2429 = vmatmul.mubr.f32.vlgmr.msra.gmra.mrb[10].mxu1 %v1081_v7  ;;  %2464 = vmatmul.mubr.f32.vlgmr.msra.gmra.mrb[26].mxu0 %v1081_v7  ;;  %v2938_v9 = vpack.c.bf16 %v1471_v14, %v1470_v34 }
 0x477   :  { %1169 = vmax.xlane.f32.xlu0 %v3532_v10  ;;  %2900 = vmatpush3.bf16.msra.mxu1 %v3474_v44 }
 0x478   :  { %2924 = vmatpush3.bf16.msra.mxu0 %v3476_v18  ;;  %2901 = vmatprep.subr.bf16.mxu1 %v3085_v0 }
 0x479   :  { %2925 = vmatprep.subr.bf16.mxu0 %v3085_v0  ;;  %2498 = vmatprep.mubr.msk.f32.mxu1 %vm3087_vm0, %v3086_v1 }
 0x47a   :  { %2533 = vmatprep.mubr.msk.f32.mxu0 %vm3087_vm0, %v3086_v1 }
 0x47b   :  { %2903 = vmatpush3.bf16.msra.mxu1 %v3479_v21 }
 0x47c   :  { %2927 = vmatpush3.bf16.msra.mxu0 %v3483_v22  ;;  %2904 = vmatprep.subr.bf16.mxu1 %v3085_v0 }
 0x47d   :  { %2928 = vmatprep.subr.bf16.mxu0 %v3085_v0 }
 0x47f   :  { %2906 = vmatpush3.bf16.msra.mxu1 %v3487_v29 }
 0x480   :  { %2930 = vmatpush3.bf16.msra.mxu0 %v3491_v33  ;;  %2907 = vmatprep.subr.bf16.mxu1 %v3085_v0 }
 0x481   :  { %2931 = vmatprep.subr.bf16.mxu0 %v3085_v0 }
 0x483   :  { %2909 = vmatpush3.bf16.msra.mxu1 %v3495_v46 }
 0x484   :  { %2933 = vmatpush3.bf16.msra.mxu0 %v3499_v48  ;;  %2910 = vmatprep.subr.bf16.mxu1 %v3085_v0 }
 0x485   :  { %2934 = vmatprep.subr.bf16.mxu0 %v3085_v0 }
 0x487   :  { %2912 = vmatpush3.bf16.msra.mxu1 %v3503_v53 }
 0x488   :  { %2913 = vmatprep.subr.bf16.mxu1 %v3085_v0  ;;  %2936 = vmatpush3.bf16.msra.mxu0 %v2935_v12 }
 0x489   :  { %2937 = vmatprep.subr.bf16.mxu0 %v3085_v0 }
 0x48b   :  { %2915 = vmatpush3.bf16.msra.mxu1 %v3509_v60 }
 0x48c   :  { %2916 = vmatprep.subr.bf16.mxu1 %v3085_v0  ;;  %2939 = vmatpush3.bf16.msra.mxu0 %v2938_v9 }
 0x48d   :  { %2940 = vmatprep.subr.bf16.mxu0 %v3085_v0 }
 0x48f   :  { %2918 = vmatpush3.bf16.msra.mxu1 %v3515_v3 }
 0x490   :  { %2919 = vmatprep.subr.bf16.mxu1 %v3085_v0  ;;  %2942 = vmatpush3.bf16.msra.mxu0 %v2941_v24 }
 0x491   :  { %2943 = vmatprep.subr.bf16.mxu0 %v3085_v0 }
 0x493   :  { %2921 = vmatpush3.bf16.msra.mxu1 %v3526_v6 }
 0x494   :  { %2946 = vmatprep.subr.bf16.mxu1 %v3085_v0  ;;  %2945 = vmatpush3.bf16.msra.mxu0 %v2944_v37 }
 0x495   :  { %2970 = vmatprep.subr.bf16.mxu0 %v3085_v0 }
 0x549   :  { %v1266_v38 = vpop.f32.mrb[10].mxu1  ;;  %v1353_v51 = vpop.f32.mrb[26].mxu0 }
 0x54a   :  { %v1270_v58 = vadd.f32 %v1266_v38, %v3332_v36  ;;  %v3569_v15 = vadd.f32 %v1353_v51, %v3334_v40  ;;  %v2430_v19 = vpop.f32.mrb[11].mxu1  ;;  %v2465_v20 = vpop.f32.mrb[27].mxu0 }
 0x54c   :  { %1358 = vmax.xlane.f32.xlu1 %v3569_v15  ;;  %2499 = vmatmul.mubr.f32.vlgmr.msra.gmra.mrb[12].mxu1 %v1270_v58 }
 0x54d   :  { %2534 = vmatmul.mubr.f32.vlgmr.msra.gmra.mrb[28].mxu0 %v1270_v58  ;;  %2948 = vmatpush3.bf16.msra.mxu1 %v3474_v44  ;;  %v792_v44 = vpop.xlane.xlu1 %791 }
 0x54e   :  { %2972 = vmatpush3.bf16.msra.mxu0 %v3476_v18  ;;  %2949 = vmatprep.subr.bf16.mxu1 %v3085_v0 }
 0x54f   :  { %2973 = vmatprep.subr.bf16.mxu0 %v3085_v0  ;;  %2568 = vmatprep.mubr.msk.f32.mxu1 %vm3087_vm0, %v3086_v1 }
 0x550   :  { %2603 = vmatprep.mubr.msk.f32.mxu0 %vm3087_vm0, %v3086_v1  ;;  %v415_v1 = vpop.xlane.xlu0 %414 }
 0x551   :  { %2951 = vmatpush3.bf16.msra.mxu1 %v3479_v21  ;;  %v416_v36 = vsub.f32 %v3346_v61, %v415_v1  ;;  %v793_v21 = vsub.f32 %v3426_v13, %v792_v44  ;;  %v981_v52 = vpop.xlane.xlu1 %980 }
 0x552   :  { %2975 = vmatpush3.bf16.msra.mxu0 %v3483_v22  ;;  %2952 = vmatprep.subr.bf16.mxu1 %v3085_v0  ;;  %v982_v59 = vsub.f32 %v3467_v23, %v981_v52 }
 0x553   :  { %2976 = vmatprep.subr.bf16.mxu0 %v3085_v0  ;;  %v417_v18 = vmul.f32 1.442695, %v416_v36  ;;  %v794_v25 = vmul.f32 1.442695, %v793_v21 }
 0x554   :  { %v603_v40 = vpop.xlane.xlu0 %602 }
 0x555   :  { %2954 = vmatpush3.bf16.msra.mxu1 %v3487_v29  ;;  %3001 = vpow2.f32 %v417_v18 }
 0x556   :  { %2978 = vmatpush3.bf16.msra.mxu0 %v3491_v33  ;;  %2955 = vmatprep.subr.bf16.mxu1 %v3085_v0  ;;  %3003 = vpow2.f32 %v794_v25 }
 0x557   :  { %2979 = vmatprep.subr.bf16.mxu0 %v3085_v0 }
 0x558   :  { %v1170_v22 = vpop.xlane.xlu0 %1169 }
 0x559   :  { %2957 = vmatpush3.bf16.msra.mxu1 %v3495_v46  ;;  %v1171_v26 = vsub.f32 %v3532_v10, %v1170_v22  ;;  %v983_v10 = vmul.f32 1.442695, %v982_v59 }
 0x55a   :  { %2981 = vmatpush3.bf16.msra.mxu0 %v3499_v48  ;;  %2958 = vmatprep.subr.bf16.mxu1 %v3085_v0 }
 0x55b   :  { %2982 = vmatprep.subr.bf16.mxu0 %v3085_v0  ;;  %v1172_v28 = vmul.f32 1.442695, %v1171_v26 }
 0x55d   :  { %2960 = vmatpush3.bf16.msra.mxu1 %v3503_v53  ;;  %3005 = vpow2.f32 %v1172_v28 }
 0x55e   :  { %2984 = vmatpush3.bf16.msra.mxu0 %v2935_v12  ;;  %2961 = vmatprep.subr.bf16.mxu1 %v3085_v0 }
 0x55f   :  { %2985 = vmatprep.subr.bf16.mxu0 %v3085_v0  ;;  %v3002_v13 = vpop.eup %3001 }
 0x560   :  { %v3004_v39 = vpop.eup %3003 }
 0x561   :  { %2963 = vmatpush3.bf16.msra.mxu1 %v3509_v60 }
 0x562   :  { %2987 = vmatpush3.bf16.msra.mxu0 %v2938_v9  ;;  %2964 = vmatprep.subr.bf16.mxu1 %v3085_v0 }
 0x563   :  { %2988 = vmatprep.subr.bf16.mxu0 %v3085_v0 }
 0x565   :  { %2966 = vmatpush3.bf16.msra.mxu1 %v3515_v3 }
 0x566   :  { %2990 = vmatpush3.bf16.msra.mxu0 %v2941_v24  ;;  %2967 = vmatprep.subr.bf16.mxu1 %v3085_v0 }
 0x567   :  { %2991 = vmatprep.subr.bf16.mxu0 %v3085_v0  ;;  %v3006_v41 = vpop.eup %3005 }
 0x569   :  { %2969 = vmatpush3.bf16.msra.mxu1 %v3526_v6  ;;  %v604_v6 = vsub.f32 %v3385_v5, %v603_v40 }
 0x56a   :  { %2993 = vmatpush3.bf16.msra.mxu0 %v2944_v37 }
 0x56b   :  { %v605_v7 = vmul.f32 1.442695, %v604_v6 }
 0x5d9   :  { %v1359_v8 = vpop.xlane.xlu1 %1358 }
 0x5da   :  { %v1360_v11 = vsub.f32 %v3569_v15, %v1359_v8 }
 0x5dc   :  { %v1361_v2 = vmul.f32 1.442695, %v1360_v11 }
 0x61f   :  { %v1455_v27 = vpop.f32.mrb[12].mxu1 }
 0x620   :  { %v1459_v0 = vadd.f32 %v1455_v27, %v3336_v43  ;;  %v1542_v29 = vpop.f32.mrb[28].mxu0  ;;  %v2500_v33 = vpop.f32.mrb[13].mxu1 }
 0x621   :  { %v1546_v35 = vadd.f32 %v1542_v29, %v3338_v47  ;;  %v2535_v61 = vpop.f32.mrb[29].mxu0 }
 0x622   :  { %2569 = vmatmul.mubr.f32.vlgmr.msra.gmra.mrb[14].mxu1 %v1459_v0  ;;  %2604 = vmatmul.mubr.f32.vlgmr.msra.gmra.mrb[30].mxu0 %v1459_v0 }
 0x623   :  { %1547 = vmax.xlane.f32.xlu0 %v1546_v35 }
 0x627   :  { %419 = vadd.xlane.f32.xlu0 %v3002_v13 }
 0x62b   :  { %796 = vadd.xlane.f32.xlu0 %v3004_v39 }
 0x62f   :  { %1174 = vadd.xlane.f32.xlu0 %v3006_v41 }
 0x6b0   :  { %v1548_v42 = vpop.xlane.xlu0 %1547 }
 0x6b1   :  { %v1549_v46 = vsub.f32 %v1546_v35, %v1548_v42 }
 0x6b3   :  { %v1550_v48 = vmul.f32 1.442695, %v1549_v46 }
 0x6b4   :  { %v420_v49 = vpop.xlane.xlu0 %419 }
 0x6b5   :  { %3007 = vpow2.f32 %v1550_v48 }
 0x6b6   :  { %3009 = vlog2.f32 %v420_v49 }
 0x6b8   :  { %v797_v43 = vpop.xlane.xlu0 %796 }
 0x6b9   :  { %3011 = vlog2.f32 %v797_v43 }
 0x6bc   :  { %v1175_v47 = vpop.xlane.xlu0 %1174 }
 0x6bd   :  { %3013 = vlog2.f32 %v1175_v47 }
 0x6be   :  { %3015 = vpow2.f32 %v605_v7 }
 0x6bf   :  { %v3008_v50 = vpop.eup %3007  ;;  %3017 = vpow2.f32 %v983_v10 }
 0x6c0   :  { %v3010_v53 = vpop.eup %3009  ;;  %1552 = vadd.xlane.f32.xlu0 %v3008_v50  ;;  %3019 = vpow2.f32 %v1361_v2 }
 0x6c1   :  { %v422_v55 = vmul.f32 0.6931472, %v3010_v53 }
 0x6c3   :  { %v3012_v57 = vpop.eup %3011  ;;  %v423_v60 = vsub.f32 %v416_v36, %v422_v55 }
 0x6c4   :  { %v799_v62 = vmul.f32 0.6931472, %v3012_v57 }
 0x6c5   :  { %424 = vst [vmem:[%s3645_s6] sm:$0xff] %v423_v60 }
 0x6c6   :  { %v800_v63 = vsub.f32 %v793_v21, %v799_v62 }
 0x6c7   :  { %v3014_v3 = vpop.eup %3013 }
 0x6c8   :  { %1768 = vst [vmem:[%s3645_s6 + $0x10] sm:$0xff] %v800_v63  ;;  %v1177_v45 = vmul.f32 0.6931472, %v3014_v3  ;;  %v3016_v5 = vpop.eup %3015 }
 0x6c9   :  { %v3018_v23 = vpop.eup %3017 }
 0x6ca   :  { %v1178_v4 = vsub.f32 %v1171_v26, %v1177_v45  ;;  %v3020_v17 = vpop.eup %3019 }
 0x6cc   :  { %1770 = vst [vmem:[%s3645_s6 + $0x20] sm:$0xff] %v1178_v4 }
 0x6f5   :  { %v1644_v32 = vpop.f32.mrb[14].mxu1  ;;  %v1731_v34 = vpop.f32.mrb[30].mxu0 }
 0x6f6   :  { %v1648_v12 = vadd.f32 %v1644_v32, %v3340_v54  ;;  %v1735_v14 = vadd.f32 %v1731_v34, %v3342_v56  ;;  %v2570_v9 = vpop.f32.mrb[15].mxu1  ;;  %v2605_v16 = vpop.f32.mrb[31].mxu0 }
 0x6f8   :  { %1748 = vst [vmem:[%s3646_s7] sm:$0xff] %v1648_v12  ;;  %1736 = vmax.xlane.f32.xlu1 %v1735_v14 }
 0x6fc   :  { %607 = vadd.xlane.f32.xlu1 %v3016_v5 }
 0x700   :  { %985 = vadd.xlane.f32.xlu1 %v3018_v23 }
 0x704   :  { %1363 = vadd.xlane.f32.xlu1 %v3020_v17 }
 0x74d   :  { %v1553_v24 = vpop.xlane.xlu0 %1552 }
 0x74e   :  { %3021 = vlog2.f32 %v1553_v24 }
 0x758   :  { %v3022_v30 = vpop.eup %3021 }
 0x759   :  { %v1555_v54 = vmul.f32 0.6931472, %v3022_v30 }
 0x75b   :  { %v1556_v31 = vsub.f32 %v1549_v46, %v1555_v54 }
 0x75d   :  { %1772 = vst [vmem:[%s3645_s6 + $0x30] sm:$0xff] %v1556_v31 }
 0x785   :  { %v1737_v56 = vpop.xlane.xlu1 %1736 }
 0x786   :  { %v1738_v37 = vsub.f32 %v1735_v14, %v1737_v56 }
 0x788   :  { %v1739_v38 = vmul.f32 1.442695, %v1738_v37 }
 0x789   :  { %v608_v51 = vpop.xlane.xlu1 %607 }
 0x78a   :  { %3023 = vpow2.f32 %v1739_v38 }
 0x78b   :  { %3025 = vlog2.f32 %v608_v51 }
 0x78d   :  { %v986_v58 = vpop.xlane.xlu1 %985 }
 0x78e   :  { %3027 = vlog2.f32 %v986_v58 }
 0x791   :  { %v1364_v15 = vpop.xlane.xlu1 %1363 }
 0x792   :  { %3029 = vlog2.f32 %v1364_v15 }
 0x794   :  { %v3024_v19 = vpop.eup %3023 }
 0x795   :  { %v3026_v20 = vpop.eup %3025  ;;  %1741 = vadd.xlane.f32.xlu1 %v3024_v19 }
 0x796   :  { %v610_v1 = vmul.f32 0.6931472, %v3026_v20 }
 0x798   :  { %v3028_v36 = vpop.eup %3027  ;;  %v611_v40 = vsub.f32 %v604_v6, %v610_v1 }
 0x799   :  { %v988_v44 = vmul.f32 0.6931472, %v3028_v36 }
 0x79a   :  { %1767 = vst [vmem:[%s3645_s6 + $0x8] sm:$0xff] %v611_v40 }
 0x79b   :  { %v989_v18 = vsub.f32 %v982_v59, %v988_v44 }
 0x79c   :  { %v3030_v21 = vpop.eup %3029 }
 0x79d   :  { %1769 = vst [vmem:[%s3645_s6 + $0x18] sm:$0xff] %v989_v18  ;;  %v1366_v22 = vmul.f32 0.6931472, %v3030_v21 }
 0x79f   :  { %v1367_v25 = vsub.f32 %v1360_v11, %v1366_v22 }
 0x7a1   :  { %1771 = vst [vmem:[%s3645_s6 + $0x28] sm:$0xff] %v1367_v25 }
 0x822   :  { %v1742_v26 = vpop.xlane.xlu1 %1741 }
 0x823   :  { %3031 = vlog2.f32 %v1742_v26 }
 0x82d   :  { %v3032_v27 = vpop.eup %3031 }
 0x82e   :  { %v1744_v28 = vmul.f32 0.6931472, %v3032_v27 }
 0x830   :  { %v1745_v0 = vsub.f32 %v1738_v37, %v1744_v28 }
 0x832   :  { %1773 = vst [vmem:[%s3645_s6 + $0x38] sm:$0xff] %v1745_v0 }
 0x833   :  { %1757 = vsyncpa [#allocation4], 1 }
 0x834   :  { %1758 = vsyncpa [#allocation6], 1 }

</bundles_post_ra>
